<compile_context>
chip_gen: v5e
topology: v5e:2x2
jax: 0.10.0
libtpu: 0.0.40
codegen_flags: <defaults>
</compile_context>

<pallas_src>
import math

import jax
import jax.numpy as jnp
from jax.experimental import pallas as pl
from jax.experimental.pallas import tpu as pltpu  # noqa: F401  (TPU backend)

# ---------------- small synthetic RoBERTa config ----------------
VOCAB = 64
MAX_POS = 40
TYPE_VOCAB = 1          # real RoBERTa has type_vocab_size=1 (grows to 3 below)
HIDDEN = 32
NUM_HEADS = 2
HEAD_DIM = HIDDEN // NUM_HEADS
INTERMEDIATE = 64
NUM_LAYERS = 2
PAD_IDX = 1
LN_EPS = 1e-5
BN_EPS = 1e-5


# ---------------- in-kernel helpers ----------------
def _layernorm(x, g, b, eps=LN_EPS):
    mu = jnp.mean(x, axis=-1, keepdims=True)
    var = jnp.mean(jnp.square(x - mu), axis=-1, keepdims=True)
    return (x - mu) * jax.lax.rsqrt(var + eps) * g + b


def _gelu(y):
    # TODO(synk): HF RoBERTa uses exact erf-GELU; tanh approximation used here
    # for Mosaic elementwise portability.
    c = math.sqrt(2.0 / math.pi)
    return 0.5 * y * (1.0 + jnp.tanh(c * (y + 0.044715 * y * y * y)))


# ---------------- single fused encoder + classifier kernel ----------------
def _encoder_kernel(x_ref, bias_ref,
                    embg_ref, embb_ref,
                    wqkv_ref, bqkv_ref, wo_ref, bo_ref, ln1g_ref, ln1b_ref,
                    wi_ref, bi_ref, wf_ref, bf_ref, ln2g_ref, ln2b_ref,
                    bng_ref, bnb_ref, bnm_ref, bnv_ref, clsw_ref, clsb_ref,
                    o_ref):
    B = bias_ref.shape[0]
    S = bias_ref.shape[2]
    scale = 1.0 / math.sqrt(HEAD_DIM)

    # Embedding LayerNorm (no residual / no zero materialisation).
    h = _layernorm(x_ref[...], embg_ref[...], embb_ref[...])          # (B*S, H)
    bias = bias_ref[...]                                              # (B, 1, S)

    for l in range(NUM_LAYERS):                     # static, fully unrolled
        # ---- fused QKV projection: one MXU pass with a 3H-wide output ----
        qkv = (jnp.dot(h, wqkv_ref[l], preferred_element_type=jnp.float32)
               + bqkv_ref[l])                                         # (B*S, 3H)

        # ---- multi-head self-attention: all batches/heads in this body ----
        wo_l = wo_ref[l]                                              # (H, H)
        attn_out = None
        for hd in range(NUM_HEADS):                 # static, fully unrolled
            off = hd * HEAD_DIM
            qh = qkv[:, off:off + HEAD_DIM].reshape(B, S, HEAD_DIM)
            kh = qkv[:, HIDDEN + off:HIDDEN + off + HEAD_DIM].reshape(B, S, HEAD_DIM)
            vh = qkv[:, 2 * HIDDEN + off:2 * HIDDEN + off + HEAD_DIM].reshape(B, S, HEAD_DIM)

            # batched contraction over head_dim -- no explicit K transpose.
            s = jnp.einsum("bqd,bkd->bqk", qh, kh,
                           preferred_element_type=jnp.float32) * scale + bias
            m = jnp.max(s, axis=-1, keepdims=True)
            e = jnp.exp(s - m)
            p = e * pl.reciprocal(jnp.sum(e, axis=-1, keepdims=True), approx=True)
            ctx = jnp.einsum("bqk,bkd->bqd", p, vh,
                             preferred_element_type=jnp.float32)
            ctx2 = ctx.reshape(B * S, HEAD_DIM)

            # Per-head slice of the output projection (avoids lane concat;
            # the per-head partial products are summed instead).
            part = jnp.dot(ctx2, wo_l[off:off + HEAD_DIM, :],
                           preferred_element_type=jnp.float32)
            attn_out = part if attn_out is None else attn_out + part
        attn_out = attn_out + bo_ref[l]
        h = _layernorm(attn_out + h, ln1g_ref[l], ln1b_ref[l])

        # ---- feed-forward ----
        inter = _gelu(jnp.dot(h, wi_ref[l], preferred_element_type=jnp.float32)
                      + bi_ref[l])
        ffn = jnp.dot(inter, wf_ref[l], preferred_element_type=jnp.float32) + bf_ref[l]
        h = _layernorm(ffn + h, ln2g_ref[l], ln2b_ref[l])

    # ---- classifier head (BatchNorm1d eval stats + Linear), fused here ----
    # Applied to every row (BN/Linear are row-wise); the wrapper keeps only the
    # CLS rows.  Dropout is identity at inference.
    bn_scale = bng_ref[...] * jax.lax.rsqrt(bnv_ref[...] + BN_EPS)
    xn = (h - bnm_ref[...]) * bn_scale + bnb_ref[...]
    logits = (jnp.dot(xn, clsw_ref[...], preferred_element_type=jnp.float32)
              + clsb_ref[...])
    o_ref[...] = logits.astype(o_ref.dtype)


# ---------------- parameter construction (deterministic) ----------------
def init_params(key):
    keys = iter(jax.random.split(key, 256))

    def nrm(shape, std=0.02):
        return jax.random.normal(next(keys), shape, jnp.float32) * std

    p = {}
    p["word_emb"] = nrm((VOCAB, HIDDEN))
    p["pos_emb"] = nrm((MAX_POS, HIDDEN))

    # add_token_type_embeddings(num_additional_embeddings=2, scale=0.5)
    tok_type = nrm((TYPE_VOCAB, HIDDEN))
    mu, sd = jnp.mean(tok_type), jnp.std(tok_type)
    noise = jax.random.normal(next(keys), (2, HIDDEN), jnp.float32) * (sd * 0.5) + mu * 0.5
    p["type_emb"] = jnp.concatenate([tok_type, tok_type + noise], axis=0)  # (3, H)

    p["emb_ln_g"] = jnp.ones((HIDDEN,), jnp.float32)
    p["emb_ln_b"] = jnp.zeros((HIDDEN,), jnp.float32)

    layers = []
    for _ in range(NUM_LAYERS):
        layers.append(dict(
            wq=nrm((HIDDEN, HIDDEN)), bq=jnp.zeros((HIDDEN,), jnp.float32),
            wk=nrm((HIDDEN, HIDDEN)), bk=jnp.zeros((HIDDEN,), jnp.float32),
            wv=nrm((HIDDEN, HIDDEN)), bv=jnp.zeros((HIDDEN,), jnp.float32),
            wo=nrm((HIDDEN, HIDDEN)), bo=jnp.zeros((HIDDEN,), jnp.float32),
            ln1_g=jnp.ones((HIDDEN,), jnp.float32),
            ln1_b=jnp.zeros((HIDDEN,), jnp.float32),
            wi=nrm((HIDDEN, INTERMEDIATE)), bi=jnp.zeros((INTERMEDIATE,), jnp.float32),
            wf=nrm((INTERMEDIATE, HIDDEN)), bf=jnp.zeros((HIDDEN,), jnp.float32),
            ln2_g=jnp.ones((HIDDEN,), jnp.float32),
            ln2_b=jnp.zeros((HIDDEN,), jnp.float32),
        ))
    p["layers"] = layers

    # classifier: BatchNorm1d(H) -> Dropout -> Linear(H, 1)
    p["bn_g"] = jnp.ones((HIDDEN,), jnp.float32)
    p["bn_b"] = jnp.zeros((HIDDEN,), jnp.float32)
    p["bn_mean"] = jnp.zeros((HIDDEN,), jnp.float32)   # running stats (eval)
    p["bn_var"] = jnp.ones((HIDDEN,), jnp.float32)
    p["cls_w"] = nrm((HIDDEN, 1))
    p["cls_b"] = jnp.zeros((1,), jnp.float32)
    return p


# ---------------- forward pass ----------------
def ruroberta_forward(params, input_ids, attention_mask, token_type_ids):
    B, S = input_ids.shape

    # RoBERTa position ids: cumsum over non-pad tokens, offset by padding_idx.
    mask_i = (input_ids != PAD_IDX).astype(jnp.int32)
    position_ids = jnp.cumsum(mask_i, axis=1) * mask_i + PAD_IDX

    # Embedding gathers stay in XLA (data-dependent gather, negligible cost).
    emb = (jnp.take(params["word_emb"], input_ids, axis=0)
           + jnp.take(params["pos_emb"], position_ids, axis=0)
           + jnp.take(params["type_emb"], token_type_ids, axis=0))
    x2 = emb.reshape(B * S, HIDDEN)

    # Extended attention mask (additive bias), shared across heads.
    bias = ((1.0 - attention_mask.astype(jnp.float32)) * -1e9)[:, None, :]  # (B,1,S)

    # Stack per-layer weights -> (L, ...) so the kernel loops over a static
    # layer index; Wq/Wk/Wv and their biases are fused into one matmul.
    lyrs = params["layers"]
    stack = lambda name: jnp.stack([lyr[name] for lyr in lyrs])
    wqkv = jnp.stack([jnp.concatenate([lyr["wq"], lyr["wk"], lyr["wv"]], axis=1)
                      for lyr in lyrs])                                  # (L, H, 3H)
    bqkv = jnp.stack([jnp.concatenate([lyr["bq"], lyr["bk"], lyr["bv"]])
                      for lyr in lyrs])[:, None, :]                      # (L, 1, 3H)
    wo, bo = stack("wo"), stack("bo")[:, None, :]
    ln1g, ln1b = stack("ln1_g")[:, None, :], stack("ln1_b")[:, None, :]
    wi, bi = stack("wi"), stack("bi")[:, None, :]
    wf, bf = stack("wf"), stack("bf")[:, None, :]
    ln2g, ln2b = stack("ln2_g")[:, None, :], stack("ln2_b")[:, None, :]

    # Whole encoder + classifier head in a single pallas_call: every weight and
    # activation fits in VMEM at this size, so one launch replaces ~20 and the
    # activation never round-trips through HBM between ops.
    logits_all = pl.pallas_call(
        _encoder_kernel,
        out_shape=jax.ShapeDtypeStruct((B * S, 1), jnp.float32),
    )(x2, bias,
      params["emb_ln_g"].reshape(1, HIDDEN), params["emb_ln_b"].reshape(1, HIDDEN),
      wqkv, bqkv, wo, bo, ln1g, ln1b, wi, bi, wf, bf, ln2g, ln2b,
      params["bn_g"].reshape(1, HIDDEN), params["bn_b"].reshape(1, HIDDEN),
      params["bn_mean"].reshape(1, HIDDEN), params["bn_var"].reshape(1, HIDDEN),
      params["cls_w"], params["cls_b"].reshape(1, 1))

    # Keep only the CLS-token logits.
    return logits_all.reshape(B, S, 1)[:, 0, :]                         # (B, 1)


if __name__ == "__main__":
    key = jax.random.PRNGKey(0)
    pkey, ikey, tkey = jax.random.split(key, 3)
    params = init_params(pkey)

    B, S = 2, 8
    input_ids = jax.random.randint(ikey, (B, S), 2, VOCAB)
    input_ids = input_ids.at[1, -2:].set(PAD_IDX)                   # some padding
    attention_mask = (input_ids != PAD_IDX).astype(jnp.int32)
    token_type_ids = jax.random.randint(tkey, (B, S), 0, 3)         # 3 type embs

    fwd = jax.jit(ruroberta_forward)
    logits = fwd(params, input_ids, attention_mask, token_type_ids)
    jax.block_until_ready(logits)
    assert logits.shape == (B, 1) and logits.dtype == jnp.float32
    print("KERNEL_OK")
</pallas_src>

<mosaic_0001>
module attributes {stable_mosaic.version = 11 : i64} {
  func.func @_encoder_kernel(%arg0: memref<16x32xf32, #tpu.memory_space<vmem>>, %arg1: memref<2x1x8xf32, #tpu.memory_space<vmem>>, %arg2: memref<1x32xf32, #tpu.memory_space<vmem>>, %arg3: memref<1x32xf32, #tpu.memory_space<vmem>>, %arg4: memref<2x32x96xf32, #tpu.memory_space<vmem>>, %arg5: memref<2x1x96xf32, #tpu.memory_space<vmem>>, %arg6: memref<2x32x32xf32, #tpu.memory_space<vmem>>, %arg7: memref<2x1x32xf32, #tpu.memory_space<vmem>>, %arg8: memref<2x1x32xf32, #tpu.memory_space<vmem>>, %arg9: memref<2x1x32xf32, #tpu.memory_space<vmem>>, %arg10: memref<2x32x64xf32, #tpu.memory_space<vmem>>, %arg11: memref<2x1x64xf32, #tpu.memory_space<vmem>>, %arg12: memref<2x64x32xf32, #tpu.memory_space<vmem>>, %arg13: memref<2x1x32xf32, #tpu.memory_space<vmem>>, %arg14: memref<2x1x32xf32, #tpu.memory_space<vmem>>, %arg15: memref<2x1x32xf32, #tpu.memory_space<vmem>>, %arg16: memref<1x32xf32, #tpu.memory_space<vmem>>, %arg17: memref<1x32xf32, #tpu.memory_space<vmem>>, %arg18: memref<1x32xf32, #tpu.memory_space<vmem>>, %arg19: memref<1x32xf32, #tpu.memory_space<vmem>>, %arg20: memref<32x1xf32, #tpu.memory_space<vmem>>, %arg21: memref<1x1xf32, #tpu.memory_space<vmem>>, %arg22: memref<16x1xf32, #tpu.memory_space<vmem>>) attributes {dimension_semantics = [], scalar_prefetch = 0 : i64, scratch_operands = 0 : i64, tpu.core_type = #tpu.core_type<tc>} {
    %c0 = arith.constant 0 : index
    %c0_0 = arith.constant 0 : index
    %0 = vector.load %arg0[%c0, %c0_0] : memref<16x32xf32, #tpu.memory_space<vmem>>, vector<16x32xf32>
    %c0_1 = arith.constant 0 : index
    %c0_2 = arith.constant 0 : index
    %1 = vector.load %arg2[%c0_1, %c0_2] : memref<1x32xf32, #tpu.memory_space<vmem>>, vector<1x32xf32>
    %c0_3 = arith.constant 0 : index
    %c0_4 = arith.constant 0 : index
    %2 = vector.load %arg3[%c0_3, %c0_4] : memref<1x32xf32, #tpu.memory_space<vmem>>, vector<1x32xf32>
    %cst = arith.constant dense<0.000000e+00> : vector<16xf32>
    %3 = vector.multi_reduction <add>, %0, %cst [1] : vector<16x32xf32> to vector<16xf32>
    %4 = vector.shape_cast %3 : vector<16xf32> to vector<16x1xf32>
    %cst_5 = arith.constant 3.200000e+01 : f32
    %5 = vector.broadcast %cst_5 : f32 to vector<16x1xf32>
    %6 = arith.divf %4, %5 : vector<16x1xf32>
    %7 = vector.broadcast %6 : vector<16x1xf32> to vector<16x32xf32>
    %8 = arith.subf %0, %7 : vector<16x32xf32>
    %9 = arith.mulf %8, %8 : vector<16x32xf32>
    %cst_6 = arith.constant dense<0.000000e+00> : vector<16xf32>
    %10 = vector.multi_reduction <add>, %9, %cst_6 [1] : vector<16x32xf32> to vector<16xf32>
    %11 = vector.shape_cast %10 : vector<16xf32> to vector<16x1xf32>
    %cst_7 = arith.constant 3.200000e+01 : f32
    %12 = vector.broadcast %cst_7 : f32 to vector<16x1xf32>
    %13 = arith.divf %11, %12 : vector<16x1xf32>
    %14 = vector.broadcast %6 : vector<16x1xf32> to vector<16x32xf32>
    %15 = arith.subf %0, %14 : vector<16x32xf32>
    %cst_8 = arith.constant 9.99999974E-6 : f32
    %16 = vector.broadcast %cst_8 : f32 to vector<16x1xf32>
    %17 = arith.addf %13, %16 : vector<16x1xf32>
    %18 = math.rsqrt %17 : vector<16x1xf32>
    %19 = vector.broadcast %18 : vector<16x1xf32> to vector<16x32xf32>
    %20 = arith.mulf %15, %19 : vector<16x32xf32>
    %21 = vector.broadcast %1 : vector<1x32xf32> to vector<16x32xf32>
    %22 = arith.mulf %20, %21 : vector<16x32xf32>
    %23 = vector.broadcast %2 : vector<1x32xf32> to vector<16x32xf32>
    %24 = arith.addf %22, %23 : vector<16x32xf32>
    %c0_9 = arith.constant 0 : index
    %c0_10 = arith.constant 0 : index
    %c0_11 = arith.constant 0 : index
    %25 = vector.load %arg1[%c0_9, %c0_10, %c0_11] : memref<2x1x8xf32, #tpu.memory_space<vmem>>, vector<2x1x8xf32>
    %c0_12 = arith.constant 0 : index
    %c0_13 = arith.constant 0 : index
    %c0_14 = arith.constant 0 : index
    %26 = vector.load %arg4[%c0_12, %c0_13, %c0_14] : memref<2x32x96xf32, #tpu.memory_space<vmem>>, vector<1x32x96xf32>
    %27 = vector.shape_cast %26 : vector<1x32x96xf32> to vector<32x96xf32>
    %cst_15 = arith.constant dense<0.000000e+00> : vector<16x96xf32>
    %28 = tpu.matmul %24, %27, %cst_15 {dimension_numbers = #tpu.dot_dimension_numbers<[1], [0], [0], [1], [0, 0, 1, 1], [], []>} : vector<16x32xf32>, vector<32x96xf32>, vector<16x96xf32> -> vector<16x96xf32>
    %c0_16 = arith.constant 0 : index
    %c0_17 = arith.constant 0 : index
    %c0_18 = arith.constant 0 : index
    %29 = vector.load %arg5[%c0_16, %c0_17, %c0_18] : memref<2x1x96xf32, #tpu.memory_space<vmem>>, vector<1x1x96xf32>
    %30 = vector.shape_cast %29 : vector<1x1x96xf32> to vector<1x96xf32>
    %31 = vector.broadcast %30 : vector<1x96xf32> to vector<16x96xf32>
    %32 = arith.addf %28, %31 : vector<16x96xf32>
    %c0_19 = arith.constant 0 : index
    %c0_20 = arith.constant 0 : index
    %c0_21 = arith.constant 0 : index
    %33 = vector.load %arg6[%c0_19, %c0_20, %c0_21] : memref<2x32x32xf32, #tpu.memory_space<vmem>>, vector<1x32x32xf32>
    %34 = vector.shape_cast %33 : vector<1x32x32xf32> to vector<32x32xf32>
    %35 = vector.extract_strided_slice %32 {offsets = [0, 0], sizes = [16, 16], strides = [1, 1]} : vector<16x96xf32> to vector<16x16xf32>
    %36 = vector.shape_cast %35 : vector<16x16xf32> to vector<2x8x16xf32>
    %37 = vector.extract_strided_slice %32 {offsets = [0, 32], sizes = [16, 16], strides = [1, 1]} : vector<16x96xf32> to vector<16x16xf32>
    %38 = vector.shape_cast %37 : vector<16x16xf32> to vector<2x8x16xf32>
    %39 = vector.extract_strided_slice %32 {offsets = [0, 64], sizes = [16, 16], strides = [1, 1]} : vector<16x96xf32> to vector<16x16xf32>
    %40 = vector.shape_cast %39 : vector<16x16xf32> to vector<2x8x16xf32>
    "tpu.trace_start"() <{level = 10 : i32, message = "bqd,bkd->bqk"}> : () -> ()
    %cst_22 = arith.constant dense<0.000000e+00> : vector<2x8x8xf32>
    %41 = tpu.matmul %36, %38, %cst_22 {dimension_numbers = #tpu.dot_dimension_numbers<[2], [2], [1], [1], [0, 0, 0, 1, 1, 1], [0], [0]>} : vector<2x8x16xf32>, vector<2x8x16xf32>, vector<2x8x8xf32> -> vector<2x8x8xf32>
    "tpu.trace_stop"() : () -> ()
    %cst_23 = arith.constant 2.500000e-01 : f32
    %42 = vector.broadcast %cst_23 : f32 to vector<2x8x8xf32>
    %43 = arith.mulf %41, %42 : vector<2x8x8xf32>
    %44 = vector.broadcast %25 : vector<2x1x8xf32> to vector<2x8x8xf32>
    %45 = arith.addf %43, %44 : vector<2x8x8xf32>
    %cst_24 = arith.constant dense<0xFF800000> : vector<2x8xf32>
    %46 = vector.multi_reduction <maximumf>, %45, %cst_24 [2] : vector<2x8x8xf32> to vector<2x8xf32>
    %47 = vector.shape_cast %46 : vector<2x8xf32> to vector<2x8x1xf32>
    %48 = vector.broadcast %47 : vector<2x8x1xf32> to vector<2x8x8xf32>
    %49 = arith.subf %45, %48 : vector<2x8x8xf32>
    %50 = math.exp %49 : vector<2x8x8xf32>
    %cst_25 = arith.constant dense<0.000000e+00> : vector<2x8xf32>
    %51 = vector.multi_reduction <add>, %50, %cst_25 [2] : vector<2x8x8xf32> to vector<2x8xf32>
    %52 = vector.shape_cast %51 : vector<2x8xf32> to vector<2x8x1xf32>
    %53 = tpu.reciprocal %52 {approx = true} : vector<2x8x1xf32> -> vector<2x8x1xf32>
    %54 = vector.broadcast %53 : vector<2x8x1xf32> to vector<2x8x8xf32>
    %55 = arith.mulf %50, %54 : vector<2x8x8xf32>
    "tpu.trace_start"() <{level = 10 : i32, message = "bqk,bkd->bqd"}> : () -> ()
    %cst_26 = arith.constant dense<0.000000e+00> : vector<2x8x16xf32>
    %56 = tpu.matmul %55, %40, %cst_26 {dimension_numbers = #tpu.dot_dimension_numbers<[2], [1], [1], [2], [0, 0, 0, 1, 1, 2], [0], [0]>} : vector<2x8x8xf32>, vector<2x8x16xf32>, vector<2x8x16xf32> -> vector<2x8x16xf32>
    "tpu.trace_stop"() : () -> ()
    %57 = vector.shape_cast %56 : vector<2x8x16xf32> to vector<16x16xf32>
    %58 = vector.extract_strided_slice %34 {offsets = [0, 0], sizes = [16, 32], strides = [1, 1]} : vector<32x32xf32> to vector<16x32xf32>
    %cst_27 = arith.constant dense<0.000000e+00> : vector<16x32xf32>
    %59 = tpu.matmul %57, %58, %cst_27 {dimension_numbers = #tpu.dot_dimension_numbers<[1], [0], [0], [1], [0, 0, 1, 1], [], []>} : vector<16x16xf32>, vector<16x32xf32>, vector<16x32xf32> -> vector<16x32xf32>
    %60 = vector.extract_strided_slice %32 {offsets = [0, 16], sizes = [16, 16], strides = [1, 1]} : vector<16x96xf32> to vector<16x16xf32>
    %61 = vector.shape_cast %60 : vector<16x16xf32> to vector<2x8x16xf32>
    %62 = vector.extract_strided_slice %32 {offsets = [0, 48], sizes = [16, 16], strides = [1, 1]} : vector<16x96xf32> to vector<16x16xf32>
    %63 = vector.shape_cast %62 : vector<16x16xf32> to vector<2x8x16xf32>
    %64 = vector.extract_strided_slice %32 {offsets = [0, 80], sizes = [16, 16], strides = [1, 1]} : vector<16x96xf32> to vector<16x16xf32>
    %65 = vector.shape_cast %64 : vector<16x16xf32> to vector<2x8x16xf32>
    "tpu.trace_start"() <{level = 10 : i32, message = "bqd,bkd->bqk"}> : () -> ()
    %cst_28 = arith.constant dense<0.000000e+00> : vector<2x8x8xf32>
    %66 = tpu.matmul %61, %63, %cst_28 {dimension_numbers = #tpu.dot_dimension_numbers<[2], [2], [1], [1], [0, 0, 0, 1, 1, 1], [0], [0]>} : vector<2x8x16xf32>, vector<2x8x16xf32>, vector<2x8x8xf32> -> vector<2x8x8xf32>
    "tpu.trace_stop"() : () -> ()
    %cst_29 = arith.constant 2.500000e-01 : f32
    %67 = vector.broadcast %cst_29 : f32 to vector<2x8x8xf32>
    %68 = arith.mulf %66, %67 : vector<2x8x8xf32>
    %69 = vector.broadcast %25 : vector<2x1x8xf32> to vector<2x8x8xf32>
    %70 = arith.addf %68, %69 : vector<2x8x8xf32>
    %cst_30 = arith.constant dense<0xFF800000> : vector<2x8xf32>
    %71 = vector.multi_reduction <maximumf>, %70, %cst_30 [2] : vector<2x8x8xf32> to vector<2x8xf32>
    %72 = vector.shape_cast %71 : vector<2x8xf32> to vector<2x8x1xf32>
    %73 = vector.broadcast %72 : vector<2x8x1xf32> to vector<2x8x8xf32>
    %74 = arith.subf %70, %73 : vector<2x8x8xf32>
    %75 = math.exp %74 : vector<2x8x8xf32>
    %cst_31 = arith.constant dense<0.000000e+00> : vector<2x8xf32>
    %76 = vector.multi_reduction <add>, %75, %cst_31 [2] : vector<2x8x8xf32> to vector<2x8xf32>
    %77 = vector.shape_cast %76 : vector<2x8xf32> to vector<2x8x1xf32>
    %78 = tpu.reciprocal %77 {approx = true} : vector<2x8x1xf32> -> vector<2x8x1xf32>
    %79 = vector.broadcast %78 : vector<2x8x1xf32> to vector<2x8x8xf32>
    %80 = arith.mulf %75, %79 : vector<2x8x8xf32>
    "tpu.trace_start"() <{level = 10 : i32, message = "bqk,bkd->bqd"}> : () -> ()
    %cst_32 = arith.constant dense<0.000000e+00> : vector<2x8x16xf32>
    %81 = tpu.matmul %80, %65, %cst_32 {dimension_numbers = #tpu.dot_dimension_numbers<[2], [1], [1], [2], [0, 0, 0, 1, 1, 2], [0], [0]>} : vector<2x8x8xf32>, vector<2x8x16xf32>, vector<2x8x16xf32> -> vector<2x8x16xf32>
    "tpu.trace_stop"() : () -> ()
    %82 = vector.shape_cast %81 : vector<2x8x16xf32> to vector<16x16xf32>
    %83 = vector.extract_strided_slice %34 {offsets = [16, 0], sizes = [16, 32], strides = [1, 1]} : vector<32x32xf32> to vector<16x32xf32>
    %cst_33 = arith.constant dense<0.000000e+00> : vector<16x32xf32>
    %84 = tpu.matmul %82, %83, %cst_33 {dimension_numbers = #tpu.dot_dimension_numbers<[1], [0], [0], [1], [0, 0, 1, 1], [], []>} : vector<16x16xf32>, vector<16x32xf32>, vector<16x32xf32> -> vector<16x32xf32>
    %85 = arith.addf %59, %84 : vector<16x32xf32>
    %c0_34 = arith.constant 0 : index
    %c0_35 = arith.constant 0 : index
    %c0_36 = arith.constant 0 : index
    %86 = vector.load %arg7[%c0_34, %c0_35, %c0_36] : memref<2x1x32xf32, #tpu.memory_space<vmem>>, vector<1x1x32xf32>
    %87 = vector.shape_cast %86 : vector<1x1x32xf32> to vector<1x32xf32>
    %88 = vector.broadcast %87 : vector<1x32xf32> to vector<16x32xf32>
    %89 = arith.addf %85, %88 : vector<16x32xf32>
    %90 = arith.addf %89, %24 : vector<16x32xf32>
    %c0_37 = arith.constant 0 : index
    %c0_38 = arith.constant 0 : index
    %c0_39 = arith.constant 0 : index
    %91 = vector.load %arg8[%c0_37, %c0_38, %c0_39] : memref<2x1x32xf32, #tpu.memory_space<vmem>>, vector<1x1x32xf32>
    %92 = vector.shape_cast %91 : vector<1x1x32xf32> to vector<1x32xf32>
    %c0_40 = arith.constant 0 : index
    %c0_41 = arith.constant 0 : index
    %c0_42 = arith.constant 0 : index
    %93 = vector.load %arg9[%c0_40, %c0_41, %c0_42] : memref<2x1x32xf32, #tpu.memory_space<vmem>>, vector<1x1x32xf32>
    %94 = vector.shape_cast %93 : vector<1x1x32xf32> to vector<1x32xf32>
    %cst_43 = arith.constant dense<0.000000e+00> : vector<16xf32>
    %95 = vector.multi_reduction <add>, %90, %cst_43 [1] : vector<16x32xf32> to vector<16xf32>
    %96 = vector.shape_cast %95 : vector<16xf32> to vector<16x1xf32>
    %cst_44 = arith.constant 3.200000e+01 : f32
    %97 = vector.broadcast %cst_44 : f32 to vector<16x1xf32>
    %98 = arith.divf %96, %97 : vector<16x1xf32>
    %99 = vector.broadcast %98 : vector<16x1xf32> to vector<16x32xf32>
    %100 = arith.subf %90, %99 : vector<16x32xf32>
    %101 = arith.mulf %100, %100 : vector<16x32xf32>
    %cst_45 = arith.constant dense<0.000000e+00> : vector<16xf32>
    %102 = vector.multi_reduction <add>, %101, %cst_45 [1] : vector<16x32xf32> to vector<16xf32>
    %103 = vector.shape_cast %102 : vector<16xf32> to vector<16x1xf32>
    %cst_46 = arith.constant 3.200000e+01 : f32
    %104 = vector.broadcast %cst_46 : f32 to vector<16x1xf32>
    %105 = arith.divf %103, %104 : vector<16x1xf32>
    %106 = vector.broadcast %98 : vector<16x1xf32> to vector<16x32xf32>
    %107 = arith.subf %90, %106 : vector<16x32xf32>
    %cst_47 = arith.constant 9.99999974E-6 : f32
    %108 = vector.broadcast %cst_47 : f32 to vector<16x1xf32>
    %109 = arith.addf %105, %108 : vector<16x1xf32>
    %110 = math.rsqrt %109 : vector<16x1xf32>
    %111 = vector.broadcast %110 : vector<16x1xf32> to vector<16x32xf32>
    %112 = arith.mulf %107, %111 : vector<16x32xf32>
    %113 = vector.broadcast %92 : vector<1x32xf32> to vector<16x32xf32>
    %114 = arith.mulf %112, %113 : vector<16x32xf32>
    %115 = vector.broadcast %94 : vector<1x32xf32> to vector<16x32xf32>
    %116 = arith.addf %114, %115 : vector<16x32xf32>
    %c0_48 = arith.constant 0 : index
    %c0_49 = arith.constant 0 : index
    %c0_50 = arith.constant 0 : index
    %117 = vector.load %arg10[%c0_48, %c0_49, %c0_50] : memref<2x32x64xf32, #tpu.memory_space<vmem>>, vector<1x32x64xf32>
    %118 = vector.shape_cast %117 : vector<1x32x64xf32> to vector<32x64xf32>
    %cst_51 = arith.constant dense<0.000000e+00> : vector<16x64xf32>
    %119 = tpu.matmul %116, %118, %cst_51 {dimension_numbers = #tpu.dot_dimension_numbers<[1], [0], [0], [1], [0, 0, 1, 1], [], []>} : vector<16x32xf32>, vector<32x64xf32>, vector<16x64xf32> -> vector<16x64xf32>
    %c0_52 = arith.constant 0 : index
    %c0_53 = arith.constant 0 : index
    %c0_54 = arith.constant 0 : index
    %120 = vector.load %arg11[%c0_52, %c0_53, %c0_54] : memref<2x1x64xf32, #tpu.memory_space<vmem>>, vector<1x1x64xf32>
    %121 = vector.shape_cast %120 : vector<1x1x64xf32> to vector<1x64xf32>
    %122 = vector.broadcast %121 : vector<1x64xf32> to vector<16x64xf32>
    %123 = arith.addf %119, %122 : vector<16x64xf32>
    %cst_55 = arith.constant 5.000000e-01 : f32
    %124 = vector.broadcast %cst_55 : f32 to vector<16x64xf32>
    %125 = arith.mulf %124, %123 : vector<16x64xf32>
    %cst_56 = arith.constant 4.471500e-02 : f32
    %126 = vector.broadcast %cst_56 : f32 to vector<16x64xf32>
    %127 = arith.mulf %126, %123 : vector<16x64xf32>
    %128 = arith.mulf %127, %123 : vector<16x64xf32>
    %129 = arith.mulf %128, %123 : vector<16x64xf32>
    %130 = arith.addf %123, %129 : vector<16x64xf32>
    %cst_57 = arith.constant 0.797884583 : f32
    %131 = vector.broadcast %cst_57 : f32 to vector<16x64xf32>
    %132 = arith.mulf %131, %130 : vector<16x64xf32>
    %133 = math.tanh %132 : vector<16x64xf32>
    %cst_58 = arith.constant 1.000000e+00 : f32
    %134 = vector.broadcast %cst_58 : f32 to vector<16x64xf32>
    %135 = arith.addf %134, %133 : vector<16x64xf32>
    %136 = arith.mulf %125, %135 : vector<16x64xf32>
    %c0_59 = arith.constant 0 : index
    %c0_60 = arith.constant 0 : index
    %c0_61 = arith.constant 0 : index
    %137 = vector.load %arg12[%c0_59, %c0_60, %c0_61] : memref<2x64x32xf32, #tpu.memory_space<vmem>>, vector<1x64x32xf32>
    %138 = vector.shape_cast %137 : vector<1x64x32xf32> to vector<64x32xf32>
    %cst_62 = arith.constant dense<0.000000e+00> : vector<16x32xf32>
    %139 = tpu.matmul %136, %138, %cst_62 {dimension_numbers = #tpu.dot_dimension_numbers<[1], [0], [0], [1], [0, 0, 1, 1], [], []>} : vector<16x64xf32>, vector<64x32xf32>, vector<16x32xf32> -> vector<16x32xf32>
    %c0_63 = arith.constant 0 : index
    %c0_64 = arith.constant 0 : index
    %c0_65 = arith.constant 0 : index
    %140 = vector.load %arg13[%c0_63, %c0_64, %c0_65] : memref<2x1x32xf32, #tpu.memory_space<vmem>>, vector<1x1x32xf32>
    %141 = vector.shape_cast %140 : vector<1x1x32xf32> to vector<1x32xf32>
    %142 = vector.broadcast %141 : vector<1x32xf32> to vector<16x32xf32>
    %143 = arith.addf %139, %142 : vector<16x32xf32>
    %144 = arith.addf %143, %116 : vector<16x32xf32>
    %c0_66 = arith.constant 0 : index
    %c0_67 = arith.constant 0 : index
    %c0_68 = arith.constant 0 : index
    %145 = vector.load %arg14[%c0_66, %c0_67, %c0_68] : memref<2x1x32xf32, #tpu.memory_space<vmem>>, vector<1x1x32xf32>
    %146 = vector.shape_cast %145 : vector<1x1x32xf32> to vector<1x32xf32>
    %c0_69 = arith.constant 0 : index
    %c0_70 = arith.constant 0 : index
    %c0_71 = arith.constant 0 : index
    %147 = vector.load %arg15[%c0_69, %c0_70, %c0_71] : memref<2x1x32xf32, #tpu.memory_space<vmem>>, vector<1x1x32xf32>
    %148 = vector.shape_cast %147 : vector<1x1x32xf32> to vector<1x32xf32>
    %cst_72 = arith.constant dense<0.000000e+00> : vector<16xf32>
    %149 = vector.multi_reduction <add>, %144, %cst_72 [1] : vector<16x32xf32> to vector<16xf32>
    %150 = vector.shape_cast %149 : vector<16xf32> to vector<16x1xf32>
    %cst_73 = arith.constant 3.200000e+01 : f32
    %151 = vector.broadcast %cst_73 : f32 to vector<16x1xf32>
    %152 = arith.divf %150, %151 : vector<16x1xf32>
    %153 = vector.broadcast %152 : vector<16x1xf32> to vector<16x32xf32>
    %154 = arith.subf %144, %153 : vector<16x32xf32>
    %155 = arith.mulf %154, %154 : vector<16x32xf32>
    %cst_74 = arith.constant dense<0.000000e+00> : vector<16xf32>
    %156 = vector.multi_reduction <add>, %155, %cst_74 [1] : vector<16x32xf32> to vector<16xf32>
    %157 = vector.shape_cast %156 : vector<16xf32> to vector<16x1xf32>
    %cst_75 = arith.constant 3.200000e+01 : f32
    %158 = vector.broadcast %cst_75 : f32 to vector<16x1xf32>
    %159 = arith.divf %157, %158 : vector<16x1xf32>
    %160 = vector.broadcast %152 : vector<16x1xf32> to vector<16x32xf32>
    %161 = arith.subf %144, %160 : vector<16x32xf32>
    %cst_76 = arith.constant 9.99999974E-6 : f32
    %162 = vector.broadcast %cst_76 : f32 to vector<16x1xf32>
    %163 = arith.addf %159, %162 : vector<16x1xf32>
    %164 = math.rsqrt %163 : vector<16x1xf32>
    %165 = vector.broadcast %164 : vector<16x1xf32> to vector<16x32xf32>
    %166 = arith.mulf %161, %165 : vector<16x32xf32>
    %167 = vector.broadcast %146 : vector<1x32xf32> to vector<16x32xf32>
    %168 = arith.mulf %166, %167 : vector<16x32xf32>
    %169 = vector.broadcast %148 : vector<1x32xf32> to vector<16x32xf32>
    %170 = arith.addf %168, %169 : vector<16x32xf32>
    %c1 = arith.constant 1 : index
    %c0_77 = arith.constant 0 : index
    %c0_78 = arith.constant 0 : index
    %171 = vector.load %arg4[%c1, %c0_77, %c0_78] : memref<2x32x96xf32, #tpu.memory_space<vmem>>, vector<1x32x96xf32>
    %172 = vector.shape_cast %171 : vector<1x32x96xf32> to vector<32x96xf32>
    %cst_79 = arith.constant dense<0.000000e+00> : vector<16x96xf32>
    %173 = tpu.matmul %170, %172, %cst_79 {dimension_numbers = #tpu.dot_dimension_numbers<[1], [0], [0], [1], [0, 0, 1, 1], [], []>} : vector<16x32xf32>, vector<32x96xf32>, vector<16x96xf32> -> vector<16x96xf32>
    %c1_80 = arith.constant 1 : index
    %c0_81 = arith.constant 0 : index
    %c0_82 = arith.constant 0 : index
    %174 = vector.load %arg5[%c1_80, %c0_81, %c0_82] : memref<2x1x96xf32, #tpu.memory_space<vmem>>, vector<1x1x96xf32>
    %175 = vector.shape_cast %174 : vector<1x1x96xf32> to vector<1x96xf32>
    %176 = vector.broadcast %175 : vector<1x96xf32> to vector<16x96xf32>
    %177 = arith.addf %173, %176 : vector<16x96xf32>
    %c1_83 = arith.constant 1 : index
    %c0_84 = arith.constant 0 : index
    %c0_85 = arith.constant 0 : index
    %178 = vector.load %arg6[%c1_83, %c0_84, %c0_85] : memref<2x32x32xf32, #tpu.memory_space<vmem>>, vector<1x32x32xf32>
    %179 = vector.shape_cast %178 : vector<1x32x32xf32> to vector<32x32xf32>
    %180 = vector.extract_strided_slice %177 {offsets = [0, 0], sizes = [16, 16], strides = [1, 1]} : vector<16x96xf32> to vector<16x16xf32>
    %181 = vector.shape_cast %180 : vector<16x16xf32> to vector<2x8x16xf32>
    %182 = vector.extract_strided_slice %177 {offsets = [0, 32], sizes = [16, 16], strides = [1, 1]} : vector<16x96xf32> to vector<16x16xf32>
    %183 = vector.shape_cast %182 : vector<16x16xf32> to vector<2x8x16xf32>
    %184 = vector.extract_strided_slice %177 {offsets = [0, 64], sizes = [16, 16], strides = [1, 1]} : vector<16x96xf32> to vector<16x16xf32>
    %185 = vector.shape_cast %184 : vector<16x16xf32> to vector<2x8x16xf32>
    "tpu.trace_start"() <{level = 10 : i32, message = "bqd,bkd->bqk"}> : () -> ()
    %cst_86 = arith.constant dense<0.000000e+00> : vector<2x8x8xf32>
    %186 = tpu.matmul %181, %183, %cst_86 {dimension_numbers = #tpu.dot_dimension_numbers<[2], [2], [1], [1], [0, 0, 0, 1, 1, 1], [0], [0]>} : vector<2x8x16xf32>, vector<2x8x16xf32>, vector<2x8x8xf32> -> vector<2x8x8xf32>
    "tpu.trace_stop"() : () -> ()
    %cst_87 = arith.constant 2.500000e-01 : f32
    %187 = vector.broadcast %cst_87 : f32 to vector<2x8x8xf32>
    %188 = arith.mulf %186, %187 : vector<2x8x8xf32>
    %189 = vector.broadcast %25 : vector<2x1x8xf32> to vector<2x8x8xf32>
    %190 = arith.addf %188, %189 : vector<2x8x8xf32>
    %cst_88 = arith.constant dense<0xFF800000> : vector<2x8xf32>
    %191 = vector.multi_reduction <maximumf>, %190, %cst_88 [2] : vector<2x8x8xf32> to vector<2x8xf32>
    %192 = vector.shape_cast %191 : vector<2x8xf32> to vector<2x8x1xf32>
    %193 = vector.broadcast %192 : vector<2x8x1xf32> to vector<2x8x8xf32>
    %194 = arith.subf %190, %193 : vector<2x8x8xf32>
    %195 = math.exp %194 : vector<2x8x8xf32>
    %cst_89 = arith.constant dense<0.000000e+00> : vector<2x8xf32>
    %196 = vector.multi_reduction <add>, %195, %cst_89 [2] : vector<2x8x8xf32> to vector<2x8xf32>
    %197 = vector.shape_cast %196 : vector<2x8xf32> to vector<2x8x1xf32>
    %198 = tpu.reciprocal %197 {approx = true} : vector<2x8x1xf32> -> vector<2x8x1xf32>
    %199 = vector.broadcast %198 : vector<2x8x1xf32> to vector<2x8x8xf32>
    %200 = arith.mulf %195, %199 : vector<2x8x8xf32>
    "tpu.trace_start"() <{level = 10 : i32, message = "bqk,bkd->bqd"}> : () -> ()
    %cst_90 = arith.constant dense<0.000000e+00> : vector<2x8x16xf32>
    %201 = tpu.matmul %200, %185, %cst_90 {dimension_numbers = #tpu.dot_dimension_numbers<[2], [1], [1], [2], [0, 0, 0, 1, 1, 2], [0], [0]>} : vector<2x8x8xf32>, vector<2x8x16xf32>, vector<2x8x16xf32> -> vector<2x8x16xf32>
    "tpu.trace_stop"() : () -> ()
    %202 = vector.shape_cast %201 : vector<2x8x16xf32> to vector<16x16xf32>
    %203 = vector.extract_strided_slice %179 {offsets = [0, 0], sizes = [16, 32], strides = [1, 1]} : vector<32x32xf32> to vector<16x32xf32>
    %cst_91 = arith.constant dense<0.000000e+00> : vector<16x32xf32>
    %204 = tpu.matmul %202, %203, %cst_91 {dimension_numbers = #tpu.dot_dimension_numbers<[1], [0], [0], [1], [0, 0, 1, 1], [], []>} : vector<16x16xf32>, vector<16x32xf32>, vector<16x32xf32> -> vector<16x32xf32>
    %205 = vector.extract_strided_slice %177 {offsets = [0, 16], sizes = [16, 16], strides = [1, 1]} : vector<16x96xf32> to vector<16x16xf32>
    %206 = vector.shape_cast %205 : vector<16x16xf32> to vector<2x8x16xf32>
    %207 = vector.extract_strided_slice %177 {offsets = [0, 48], sizes = [16, 16], strides = [1, 1]} : vector<16x96xf32> to vector<16x16xf32>
    %208 = vector.shape_cast %207 : vector<16x16xf32> to vector<2x8x16xf32>
    %209 = vector.extract_strided_slice %177 {offsets = [0, 80], sizes = [16, 16], strides = [1, 1]} : vector<16x96xf32> to vector<16x16xf32>
    %210 = vector.shape_cast %209 : vector<16x16xf32> to vector<2x8x16xf32>
    "tpu.trace_start"() <{level = 10 : i32, message = "bqd,bkd->bqk"}> : () -> ()
    %cst_92 = arith.constant dense<0.000000e+00> : vector<2x8x8xf32>
    %211 = tpu.matmul %206, %208, %cst_92 {dimension_numbers = #tpu.dot_dimension_numbers<[2], [2], [1], [1], [0, 0, 0, 1, 1, 1], [0], [0]>} : vector<2x8x16xf32>, vector<2x8x16xf32>, vector<2x8x8xf32> -> vector<2x8x8xf32>
    "tpu.trace_stop"() : () -> ()
    %cst_93 = arith.constant 2.500000e-01 : f32
    %212 = vector.broadcast %cst_93 : f32 to vector<2x8x8xf32>
    %213 = arith.mulf %211, %212 : vector<2x8x8xf32>
    %214 = vector.broadcast %25 : vector<2x1x8xf32> to vector<2x8x8xf32>
    %215 = arith.addf %213, %214 : vector<2x8x8xf32>
    %cst_94 = arith.constant dense<0xFF800000> : vector<2x8xf32>
    %216 = vector.multi_reduction <maximumf>, %215, %cst_94 [2] : vector<2x8x8xf32> to vector<2x8xf32>
    %217 = vector.shape_cast %216 : vector<2x8xf32> to vector<2x8x1xf32>
    %218 = vector.broadcast %217 : vector<2x8x1xf32> to vector<2x8x8xf32>
    %219 = arith.subf %215, %218 : vector<2x8x8xf32>
    %220 = math.exp %219 : vector<2x8x8xf32>
    %cst_95 = arith.constant dense<0.000000e+00> : vector<2x8xf32>
    %221 = vector.multi_reduction <add>, %220, %cst_95 [2] : vector<2x8x8xf32> to vector<2x8xf32>
    %222 = vector.shape_cast %221 : vector<2x8xf32> to vector<2x8x1xf32>
    %223 = tpu.reciprocal %222 {approx = true} : vector<2x8x1xf32> -> vector<2x8x1xf32>
    %224 = vector.broadcast %223 : vector<2x8x1xf32> to vector<2x8x8xf32>
    %225 = arith.mulf %220, %224 : vector<2x8x8xf32>
    "tpu.trace_start"() <{level = 10 : i32, message = "bqk,bkd->bqd"}> : () -> ()
    %cst_96 = arith.constant dense<0.000000e+00> : vector<2x8x16xf32>
    %226 = tpu.matmul %225, %210, %cst_96 {dimension_numbers = #tpu.dot_dimension_numbers<[2], [1], [1], [2], [0, 0, 0, 1, 1, 2], [0], [0]>} : vector<2x8x8xf32>, vector<2x8x16xf32>, vector<2x8x16xf32> -> vector<2x8x16xf32>
    "tpu.trace_stop"() : () -> ()
    %227 = vector.shape_cast %226 : vector<2x8x16xf32> to vector<16x16xf32>
    %228 = vector.extract_strided_slice %179 {offsets = [16, 0], sizes = [16, 32], strides = [1, 1]} : vector<32x32xf32> to vector<16x32xf32>
    %cst_97 = arith.constant dense<0.000000e+00> : vector<16x32xf32>
    %229 = tpu.matmul %227, %228, %cst_97 {dimension_numbers = #tpu.dot_dimension_numbers<[1], [0], [0], [1], [0, 0, 1, 1], [], []>} : vector<16x16xf32>, vector<16x32xf32>, vector<16x32xf32> -> vector<16x32xf32>
    %230 = arith.addf %204, %229 : vector<16x32xf32>
    %c1_98 = arith.constant 1 : index
    %c0_99 = arith.constant 0 : index
    %c0_100 = arith.constant 0 : index
    %231 = vector.load %arg7[%c1_98, %c0_99, %c0_100] : memref<2x1x32xf32, #tpu.memory_space<vmem>>, vector<1x1x32xf32>
    %232 = vector.shape_cast %231 : vector<1x1x32xf32> to vector<1x32xf32>
    %233 = vector.broadcast %232 : vector<1x32xf32> to vector<16x32xf32>
    %234 = arith.addf %230, %233 : vector<16x32xf32>
    %235 = arith.addf %234, %170 : vector<16x32xf32>
    %c1_101 = arith.constant 1 : index
    %c0_102 = arith.constant 0 : index
    %c0_103 = arith.constant 0 : index
    %236 = vector.load %arg8[%c1_101, %c0_102, %c0_103] : memref<2x1x32xf32, #tpu.memory_space<vmem>>, vector<1x1x32xf32>
    %237 = vector.shape_cast %236 : vector<1x1x32xf32> to vector<1x32xf32>
    %c1_104 = arith.constant 1 : index
    %c0_105 = arith.constant 0 : index
    %c0_106 = arith.constant 0 : index
    %238 = vector.load %arg9[%c1_104, %c0_105, %c0_106] : memref<2x1x32xf32, #tpu.memory_space<vmem>>, vector<1x1x32xf32>
    %239 = vector.shape_cast %238 : vector<1x1x32xf32> to vector<1x32xf32>
    %cst_107 = arith.constant dense<0.000000e+00> : vector<16xf32>
    %240 = vector.multi_reduction <add>, %235, %cst_107 [1] : vector<16x32xf32> to vector<16xf32>
    %241 = vector.shape_cast %240 : vector<16xf32> to vector<16x1xf32>
    %cst_108 = arith.constant 3.200000e+01 : f32
    %242 = vector.broadcast %cst_108 : f32 to vector<16x1xf32>
    %243 = arith.divf %241, %242 : vector<16x1xf32>
    %244 = vector.broadcast %243 : vector<16x1xf32> to vector<16x32xf32>
    %245 = arith.subf %235, %244 : vector<16x32xf32>
    %246 = arith.mulf %245, %245 : vector<16x32xf32>
    %cst_109 = arith.constant dense<0.000000e+00> : vector<16xf32>
    %247 = vector.multi_reduction <add>, %246, %cst_109 [1] : vector<16x32xf32> to vector<16xf32>
    %248 = vector.shape_cast %247 : vector<16xf32> to vector<16x1xf32>
    %cst_110 = arith.constant 3.200000e+01 : f32
    %249 = vector.broadcast %cst_110 : f32 to vector<16x1xf32>
    %250 = arith.divf %248, %249 : vector<16x1xf32>
    %251 = vector.broadcast %243 : vector<16x1xf32> to vector<16x32xf32>
    %252 = arith.subf %235, %251 : vector<16x32xf32>
    %cst_111 = arith.constant 9.99999974E-6 : f32
    %253 = vector.broadcast %cst_111 : f32 to vector<16x1xf32>
    %254 = arith.addf %250, %253 : vector<16x1xf32>
    %255 = math.rsqrt %254 : vector<16x1xf32>
    %256 = vector.broadcast %255 : vector<16x1xf32> to vector<16x32xf32>
    %257 = arith.mulf %252, %256 : vector<16x32xf32>
    %258 = vector.broadcast %237 : vector<1x32xf32> to vector<16x32xf32>
    %259 = arith.mulf %257, %258 : vector<16x32xf32>
    %260 = vector.broadcast %239 : vector<1x32xf32> to vector<16x32xf32>
    %261 = arith.addf %259, %260 : vector<16x32xf32>
    %c1_112 = arith.constant 1 : index
    %c0_113 = arith.constant 0 : index
    %c0_114 = arith.constant 0 : index
    %262 = vector.load %arg10[%c1_112, %c0_113, %c0_114] : memref<2x32x64xf32, #tpu.memory_space<vmem>>, vector<1x32x64xf32>
    %263 = vector.shape_cast %262 : vector<1x32x64xf32> to vector<32x64xf32>
    %cst_115 = arith.constant dense<0.000000e+00> : vector<16x64xf32>
    %264 = tpu.matmul %261, %263, %cst_115 {dimension_numbers = #tpu.dot_dimension_numbers<[1], [0], [0], [1], [0, 0, 1, 1], [], []>} : vector<16x32xf32>, vector<32x64xf32>, vector<16x64xf32> -> vector<16x64xf32>
    %c1_116 = arith.constant 1 : index
    %c0_117 = arith.constant 0 : index
    %c0_118 = arith.constant 0 : index
    %265 = vector.load %arg11[%c1_116, %c0_117, %c0_118] : memref<2x1x64xf32, #tpu.memory_space<vmem>>, vector<1x1x64xf32>
    %266 = vector.shape_cast %265 : vector<1x1x64xf32> to vector<1x64xf32>
    %267 = vector.broadcast %266 : vector<1x64xf32> to vector<16x64xf32>
    %268 = arith.addf %264, %267 : vector<16x64xf32>
    %cst_119 = arith.constant 5.000000e-01 : f32
    %269 = vector.broadcast %cst_119 : f32 to vector<16x64xf32>
    %270 = arith.mulf %269, %268 : vector<16x64xf32>
    %cst_120 = arith.constant 4.471500e-02 : f32
    %271 = vector.broadcast %cst_120 : f32 to vector<16x64xf32>
    %272 = arith.mulf %271, %268 : vector<16x64xf32>
    %273 = arith.mulf %272, %268 : vector<16x64xf32>
    %274 = arith.mulf %273, %268 : vector<16x64xf32>
    %275 = arith.addf %268, %274 : vector<16x64xf32>
    %cst_121 = arith.constant 0.797884583 : f32
    %276 = vector.broadcast %cst_121 : f32 to vector<16x64xf32>
    %277 = arith.mulf %276, %275 : vector<16x64xf32>
    %278 = math.tanh %277 : vector<16x64xf32>
    %cst_122 = arith.constant 1.000000e+00 : f32
    %279 = vector.broadcast %cst_122 : f32 to vector<16x64xf32>
    %280 = arith.addf %279, %278 : vector<16x64xf32>
    %281 = arith.mulf %270, %280 : vector<16x64xf32>
    %c1_123 = arith.constant 1 : index
    %c0_124 = arith.constant 0 : index
    %c0_125 = arith.constant 0 : index
    %282 = vector.load %arg12[%c1_123, %c0_124, %c0_125] : memref<2x64x32xf32, #tpu.memory_space<vmem>>, vector<1x64x32xf32>
    %283 = vector.shape_cast %282 : vector<1x64x32xf32> to vector<64x32xf32>
    %cst_126 = arith.constant dense<0.000000e+00> : vector<16x32xf32>
    %284 = tpu.matmul %281, %283, %cst_126 {dimension_numbers = #tpu.dot_dimension_numbers<[1], [0], [0], [1], [0, 0, 1, 1], [], []>} : vector<16x64xf32>, vector<64x32xf32>, vector<16x32xf32> -> vector<16x32xf32>
    %c1_127 = arith.constant 1 : index
    %c0_128 = arith.constant 0 : index
    %c0_129 = arith.constant 0 : index
    %285 = vector.load %arg13[%c1_127, %c0_128, %c0_129] : memref<2x1x32xf32, #tpu.memory_space<vmem>>, vector<1x1x32xf32>
    %286 = vector.shape_cast %285 : vector<1x1x32xf32> to vector<1x32xf32>
    %287 = vector.broadcast %286 : vector<1x32xf32> to vector<16x32xf32>
    %288 = arith.addf %284, %287 : vector<16x32xf32>
    %289 = arith.addf %288, %261 : vector<16x32xf32>
    %c1_130 = arith.constant 1 : index
    %c0_131 = arith.constant 0 : index
    %c0_132 = arith.constant 0 : index
    %290 = vector.load %arg14[%c1_130, %c0_131, %c0_132] : memref<2x1x32xf32, #tpu.memory_space<vmem>>, vector<1x1x32xf32>
    %291 = vector.shape_cast %290 : vector<1x1x32xf32> to vector<1x32xf32>
    %c1_133 = arith.constant 1 : index
    %c0_134 = arith.constant 0 : index
    %c0_135 = arith.constant 0 : index
    %292 = vector.load %arg15[%c1_133, %c0_134, %c0_135] : memref<2x1x32xf32, #tpu.memory_space<vmem>>, vector<1x1x32xf32>
    %293 = vector.shape_cast %292 : vector<1x1x32xf32> to vector<1x32xf32>
    %cst_136 = arith.constant dense<0.000000e+00> : vector<16xf32>
    %294 = vector.multi_reduction <add>, %289, %cst_136 [1] : vector<16x32xf32> to vector<16xf32>
    %295 = vector.shape_cast %294 : vector<16xf32> to vector<16x1xf32>
    %cst_137 = arith.constant 3.200000e+01 : f32
    %296 = vector.broadcast %cst_137 : f32 to vector<16x1xf32>
    %297 = arith.divf %295, %296 : vector<16x1xf32>
    %298 = vector.broadcast %297 : vector<16x1xf32> to vector<16x32xf32>
    %299 = arith.subf %289, %298 : vector<16x32xf32>
    %300 = arith.mulf %299, %299 : vector<16x32xf32>
    %cst_138 = arith.constant dense<0.000000e+00> : vector<16xf32>
    %301 = vector.multi_reduction <add>, %300, %cst_138 [1] : vector<16x32xf32> to vector<16xf32>
    %302 = vector.shape_cast %301 : vector<16xf32> to vector<16x1xf32>
    %cst_139 = arith.constant 3.200000e+01 : f32
    %303 = vector.broadcast %cst_139 : f32 to vector<16x1xf32>
    %304 = arith.divf %302, %303 : vector<16x1xf32>
    %305 = vector.broadcast %297 : vector<16x1xf32> to vector<16x32xf32>
    %306 = arith.subf %289, %305 : vector<16x32xf32>
    %cst_140 = arith.constant 9.99999974E-6 : f32
    %307 = vector.broadcast %cst_140 : f32 to vector<16x1xf32>
    %308 = arith.addf %304, %307 : vector<16x1xf32>
    %309 = math.rsqrt %308 : vector<16x1xf32>
    %310 = vector.broadcast %309 : vector<16x1xf32> to vector<16x32xf32>
    %311 = arith.mulf %306, %310 : vector<16x32xf32>
    %312 = vector.broadcast %291 : vector<1x32xf32> to vector<16x32xf32>
    %313 = arith.mulf %311, %312 : vector<16x32xf32>
    %314 = vector.broadcast %293 : vector<1x32xf32> to vector<16x32xf32>
    %315 = arith.addf %313, %314 : vector<16x32xf32>
    %c0_141 = arith.constant 0 : index
    %c0_142 = arith.constant 0 : index
    %316 = vector.load %arg16[%c0_141, %c0_142] : memref<1x32xf32, #tpu.memory_space<vmem>>, vector<1x32xf32>
    %c0_143 = arith.constant 0 : index
    %c0_144 = arith.constant 0 : index
    %317 = vector.load %arg19[%c0_143, %c0_144] : memref<1x32xf32, #tpu.memory_space<vmem>>, vector<1x32xf32>
    %cst_145 = arith.constant 9.99999974E-6 : f32
    %318 = vector.broadcast %cst_145 : f32 to vector<1x32xf32>
    %319 = arith.addf %317, %318 : vector<1x32xf32>
    %320 = math.rsqrt %319 : vector<1x32xf32>
    %321 = arith.mulf %316, %320 : vector<1x32xf32>
    %c0_146 = arith.constant 0 : index
    %c0_147 = arith.constant 0 : index
    %322 = vector.load %arg18[%c0_146, %c0_147] : memref<1x32xf32, #tpu.memory_space<vmem>>, vector<1x32xf32>
    %323 = vector.broadcast %322 : vector<1x32xf32> to vector<16x32xf32>
    %324 = arith.subf %315, %323 : vector<16x32xf32>
    %325 = vector.broadcast %321 : vector<1x32xf32> to vector<16x32xf32>
    %326 = arith.mulf %324, %325 : vector<16x32xf32>
    %c0_148 = arith.constant 0 : index
    %c0_149 = arith.constant 0 : index
    %327 = vector.load %arg17[%c0_148, %c0_149] : memref<1x32xf32, #tpu.memory_space<vmem>>, vector<1x32xf32>
    %328 = vector.broadcast %327 : vector<1x32xf32> to vector<16x32xf32>
    %329 = arith.addf %326, %328 : vector<16x32xf32>
    %c0_150 = arith.constant 0 : index
    %c0_151 = arith.constant 0 : index
    %330 = vector.load %arg20[%c0_150, %c0_151] : memref<32x1xf32, #tpu.memory_space<vmem>>, vector<32x1xf32>
    %cst_152 = arith.constant dense<0.000000e+00> : vector<16x1xf32>
    %331 = tpu.matmul %329, %330, %cst_152 {dimension_numbers = #tpu.dot_dimension_numbers<[1], [0], [0], [1], [0, 0, 1, 1], [], []>} : vector<16x32xf32>, vector<32x1xf32>, vector<16x1xf32> -> vector<16x1xf32>
    %c0_153 = arith.constant 0 : index
    %c0_154 = arith.constant 0 : index
    %332 = vector.load %arg21[%c0_153, %c0_154] : memref<1x1xf32, #tpu.memory_space<vmem>>, vector<1x1xf32>
    %333 = vector.broadcast %332 : vector<1x1xf32> to vector<16x1xf32>
    %334 = arith.addf %331, %333 : vector<16x1xf32>
    %c0_155 = arith.constant 0 : index
    %c0_156 = arith.constant 0 : index
    %335 = vector.load %arg22[%c0_155, %c0_156] : memref<16x1xf32, #tpu.memory_space<vmem>>, vector<16x1xf32>
    tpu.vector_store %arg22[%c0_155, %c0_156], %334 {strides = array<i32>} : memref<16x1xf32, #tpu.memory_space<vmem>>, vector<16x1xf32>,
    return
  }
}

</mosaic_0001>

<bundles_post_ra>
// kernel: ruroberta_forward.1
= control target key start
LH: loop header
LB: loop body
LE: loop exit
PB: predicated region body
PF: predicated region fallthrough
CT: control target
= control target key end

     0   :  { %vm77_vm0 = vcmask 261120   ;;  %v1580_v4 = vmov 32.0   ;;  %s1581_s24 = smov 80   ;;  %s2135_s25 = smov 112   ;;  %vm185_vm8 = vcmask 130048   ;;  %vm247_vm9 = vcmask 64512   ;;  %s2105_s0 = inlined_call_operand.vmem [shape: f32[16,32], index: 0, kind: input, shape index: {}]   ;;  %s2106_s2 = inlined_call_operand.vmem [shape: f32[1,32], index: 2, kind: input, shape index: {}]   ;;  %s2107_s3 = inlined_call_operand.vmem [shape: f32[1,32], index: 3, kind: input, shape index: {}]   ;;  %s2108_s5 = inlined_call_operand.vmem [shape: f32[2,1,96], index: 5, kind: input, shape index: {}]   ;;  %s2109_s4 = inlined_call_operand.vmem [shape: f32[2,32,96], index: 4, kind: input, shape index: {}]   ;;  %s2110_s1 = inlined_call_operand.vmem [shape: f32[2,1,8], index: 1, kind: input, shape index: {}]   ;;  %s2111_s6 = inlined_call_operand.vmem [shape: f32[2,32,32], index: 6, kind: input, shape index: {}]   ;;  %s2112_s7 = inlined_call_operand.vmem [shape: f32[2,1,32], index: 7, kind: input, shape index: {}]   ;;  %s2113_s8 = inlined_call_operand.vmem [shape: f32[2,1,32], index: 8, kind: input, shape index: {}]   ;;  %s2114_s9 = inlined_call_operand.vmem [shape: f32[2,1,32], index: 9, kind: input, shape index: {}]   ;;  %s2115_s11 = inlined_call_operand.vmem [shape: f32[2,1,64], index: 11, kind: input, shape index: {}]   ;;  %s2116_s10 = inlined_call_operand.vmem [shape: f32[2,32,64], index: 10, kind: input, shape index: {}]   ;;  %s2117_s13 = inlined_call_operand.vmem [shape: f32[2,1,32], index: 13, kind: input, shape index: {}]   ;;  %s2118_s12 = inlined_call_operand.vmem [shape: f32[2,64,32], index: 12, kind: input, shape index: {}]   ;;  %s2119_s14 = inlined_call_operand.vmem [shape: f32[2,1,32], index: 14, kind: input, shape index: {}]   ;;  %s2120_s15 = inlined_call_operand.vmem [shape: f32[2,1,32], index: 15, kind: input, shape index: {}]   ;;  %s2121_s18 = inlined_call_operand.vmem [shape: f32[1,32], index: 18, kind: input, shape index: {}]   ;;  %s2122_s17 = inlined_call_operand.vmem [shape: f32[1,32], index: 17, kind: input, shape index: {}]   ;;  %s2123_s19 = inlined_call_operand.vmem [shape: f32[1,32], index: 19, kind: input, shape index: {}]   ;;  %s2124_s20 = inlined_call_operand.vmem [shape: f32[32,1], index: 20, kind: input, shape index: {}]   ;;  %s2125_s21 = inlined_call_operand.<no memory space> [shape: f32[1,1], index: 21, kind: input, shape index: {}]   ;;  %s2126_s16 = inlined_call_operand.vmem [shape: f32[1,32], index: 16, kind: input, shape index: {}]   ;;  %s2127_s22 = inlined_call_operand.vmem [shape: f32[16,1], index: 22, kind: output, shape index: {}]  }
   0x1   :  { %2137 = sst [smem:[#allocation3_spill]] %s2105_s0  ;;  %1516 = vrcp.f32 %v1580_v4  ;;  %s2133_s30 = smov 48  }
   0x2   :  { %2138 = sst [smem:[#allocation4_spill]] %s2106_s2  ;;  %s2151_s0 = smov 112  }
   0x3   :  { %2139 = sst [smem:[#allocation5_spill]] %s2107_s3 }
   0x4   :  { %2140 = sst [smem:[#allocation6_spill]] %s2108_s5 }
   0x5   :  { %2141 = sst [smem:[#allocation7_spill]] %s2109_s4 }
   0x6   :  { %2142 = sst [smem:[#allocation8_spill]] %s2110_s1 }
   0x7   :  { %2143 = sst [smem:[#allocation9_spill]] %s2111_s6  ;;  %v1517_v5 = vpop.eup %1516  ;;  %s1582_s6 = smov 96  }
   0x8   :  { %s2144_s29 = sld [smem:[#allocation3_spill]]  ;;  %v85_v6 = vmul.f32 32.0, %v1517_v5  ;;  %vm89_vm1 = vweird.f32 %v1517_v5 }
   0x9   :  { %s2145_s23 = sld [smem:[#allocation7_spill]] }
   0xa   :  { %v86_v7 = vsub.f32 1.0, %v85_v6  ;;  %s2146_s28 = sld [smem:[#allocation4_spill]] }
   0xb   :  { %s2147_s4 = sld [smem:[#allocation5_spill]] }
   0xc   :  { %v87_v8 = vmul.f32 %v1517_v5, %v86_v7  ;;  %s2148_s2 = sld [smem:[#allocation6_spill]] }
   0xd   :  { %s2149_s27 = sld [smem:[#allocation8_spill]] }
   0xe   :  { %v73_v0 = vld [vmem:[%s2144_s29] sm:$0xff]  ;;  %v74_v2 = vld [vmem:[%s2144_s29 + $0x8] sm:$0xff]  ;;  %v88_v9 = vadd.f32 %v1517_v5, %v87_v8  ;;  %s2134_s29 = smov 64   ;;  %s2150_s1 = sld [smem:[#allocation9_spill]] }
   0xf   :  { %v78_v1 = vsel %vm77_vm0, %v73_v0, 0.0  ;;  %v81_v3 = vsel %vm77_vm0, %v74_v2, 0.0  ;;  %v144_v21 = vld [vmem:[%s2145_s23 + $0x18] sm:$0xff]  ;;  %v143_v22 = vld [vmem:[%s2145_s23 + $0x10] sm:$0xff]  ;;  %v142_v23 = vld [vmem:[%s2145_s23 + $0x8] sm:$0xff] }
  0x10   :  { %79 = vadd.xlane.f32.xlu0 %v78_v1  ;;  %v1709_v10 = vsel %vm89_vm1, %v1517_v5, %v88_v9  ;;  %167 = vmatpush.msra.mxu0 %v144_v21  ;;  %v141_v24 = vld [vmem:[%s2145_s23] sm:$0xff]  ;;  %vm645_vm1 = vcmask 523264  }
  0x11   :  { %v1493_v39 = vld [vmem:[%s2146_s28] ss:$0 sm:$0xff] }
  0x12   :  { %168 = vmatpush.msra.mxu0 %v143_v22  ;;  %v1494_v43 = vld [vmem:[%s2147_s4] ss:$0 sm:$0xff] }
  0x13   :  { %v1495_v53 = vld [vmem:[%s2148_s2] ss:$0 sm:$0xff]  ;;  %v1782_v5 = vld [vmem:[%s2149_s27 + $0x1] ss:$0 sm:$0xff] }
  0x14   :  { %169 = vmatpush.msra.mxu0 %v142_v23 }
  0x16   :  { %170 = vmatpush.msra.mxu0 %v141_v24 }
  0x18   :  { %82 = vadd.xlane.f32.xlu0 %v81_v3 }
  0x83   :  { %v80_v11 = vpop.xlane.xlu0 %79 }
  0x84   :  { %v91_v12 = vmul.f32 %v1709_v10, %v80_v11 }
  0x86   :  { %v93_v13 = vsub.f32 %v73_v0, %v91_v12  ;;  %v1775_v0 = vld [vmem:[%s2149_s27] ss:$0 sm:$0xff] }
  0x88   :  { %v95_v14 = vmul.f32 %v93_v13, %v93_v13 }
  0x8a   :  { %v97_v15 = vsel %vm77_vm0, %v95_v14, 0.0 }
  0x8b   :  { %98 = vadd.xlane.f32.xlu1 %v97_v15  ;;  %v83_v16 = vpop.xlane.xlu0 %82 }
  0x8c   :  { %v92_v17 = vmul.f32 %v1709_v10, %v83_v16 }
  0x8e   :  { %v94_v18 = vsub.f32 %v74_v2, %v92_v17 }
  0x90   :  { %v96_v19 = vmul.f32 %v94_v18, %v94_v18 }
  0x92   :  { %v100_v20 = vsel %vm77_vm0, %v96_v19, 0.0 }
  0x93   :  { %101 = vadd.xlane.f32.xlu1 %v100_v20 }
  0xfe   :  { %v99_v25 = vpop.xlane.xlu1 %98 }
  0xff   :  { %v103_v26 = vmul.f32 %v99_v25, %v1709_v10 }
 0x101   :  { %v105_v27 = vadd.f32 1e-05, %v103_v26 }
 0x103   :  { %1518 = vrsqrt.f32 %v105_v27  ;;  %vm113_vm3 = vweird.f32 %v105_v27 }
 0x106   :  { %v102_v28 = vpop.xlane.xlu1 %101 }
 0x107   :  { %v104_v29 = vmul.f32 %v102_v28, %v1709_v10 }
 0x109   :  { %v1519_v30 = vpop.eup %1518  ;;  %v106_v31 = vadd.f32 1e-05, %v104_v29 }
 0x10a   :  { %v108_v32 = vmul.f32 %v1519_v30, %v105_v27  ;;  %vm114_vm2 = vweird.f32 %v1519_v30 }
 0x10b   :  { %1520 = vrsqrt.f32 %v106_v31  ;;  %vm115_vm4 = vmor %vm113_vm3, %vm114_vm2  ;;  %vm123_vm5 = vweird.f32 %v106_v31 }
 0x10c   :  { %v109_v33 = vmul.f32 %v1519_v30, %v108_v32 }
 0x10e   :  { %v110_v34 = vmul.f32 0.5, %v109_v33 }
 0x110   :  { %v111_v35 = vsub.f32 1.5, %v110_v34 }
 0x111   :  { %v1521_v36 = vpop.eup %1520 }
 0x112   :  { %v112_v37 = vmul.f32 %v1519_v30, %v111_v35  ;;  %v118_v38 = vmul.f32 %v1521_v36, %v106_v31  ;;  %vm124_vm6 = vweird.f32 %v1521_v36 }
 0x113   :  { %vm125_vm7 = vmor %vm123_vm5, %vm124_vm6 }
 0x114   :  { %v116_v40 = vsel %vm115_vm4, %v1519_v30, %v112_v37  ;;  %v119_v41 = vmul.f32 %v1521_v36, %v118_v38 }
 0x115   :  { %v127_v42 = vmul.f32 %v116_v40, %v93_v13 }
 0x116   :  { %v120_v44 = vmul.f32 0.5, %v119_v41 }
 0x117   :  { %v132_v45 = vmul.f32 %v1493_v39, %v127_v42 }
 0x118   :  { %v121_v46 = vsub.f32 1.5, %v120_v44 }
 0x119   :  { %v1735_v47 = vadd.f32 %v1494_v43, %v132_v45 }
 0x11a   :  { %v122_v48 = vmul.f32 %v1521_v36, %v121_v46 }
 0x11b   :  { %1403 = vmatmul.msk.f32.vlgmr.msra.gmra.mxu0 %vm77_vm0, %v1735_v47 }
 0x11c   :  { %v126_v49 = vsel %vm125_vm7, %v1521_v36, %v122_v48 }
 0x11d   :  { %v128_v50 = vmul.f32 %v126_v49, %v94_v18 }
 0x11f   :  { %v133_v51 = vmul.f32 %v1493_v39, %v128_v50 }
 0x121   :  { %v1739_v52 = vadd.f32 %v1494_v43, %v133_v51 }
 0x123   :  { %1404 = vmatmul.msk.f32.gmra.mxu0 %vm77_vm0, %v1739_v52 }
 0x198   :  { %v172_v54 = vpop.f32.mrf.mxu0 }
 0x199   :  { %v1746_v55 = vadd.f32 %v1495_v53, %v172_v54 }
 0x19b   :  { %324 = vrot.lane.b32.xlu0 %v1746_v55, %s1581_s24  ;;  %183 = vrot.lane.b32.xlu2 %v1746_v55, %s1582_s6 }
 0x19c   :  { %322 = vrot.lane.b32.xlu1 %v1746_v55, %s2135_s25 }
 0x1a0   :  { %v175_v56 = vpop.f32.mrf.mxu0 }
 0x1a1   :  { %v1754_v57 = vadd.f32 %v1495_v53, %v175_v56 }
 0x1a3   :  { %211 = vrot.lane.b32.xlu2 %v1754_v57, %s1582_s6 }
 0x1ab   :  { %352 = vrot.lane.b32.xlu2 %v1754_v57, %s1581_s24 }
 0x1b3   :  { %350 = vrot.lane.b32.xlu2 %v1754_v57, %s2135_s25 }
 0x1f5   :  { %v184_v58 = vpop.permute.xlu2 %183 }
 0x1f6   :  { %1405 = vmatpush.xpose.msk.msra.mxu2 %vm185_vm8, %v184_v58  ;;  %v180_v58 = vld [vmem:[%s2150_s1 + $0x10] sm:$0xff] }
 0x1f9   :  { %1406 = vmatmul.msk.f32.vlgmr.msra.gmra.mxu2 %vm185_vm8, %v1746_v55 }
 0x1fd   :  { %v212_v59 = vpop.permute.xlu2 %211 }
 0x1fe   :  { %1407 = vmatpush.xpose.msk.msrb.mxu2 %vm185_vm8, %v212_v59  ;;  %v179_v59 = vld [vmem:[%s2150_s1 + $0x8] sm:$0xff] }
 0x201   :  { %1408 = vmatmul.msk.f32.vlgmr.msrb.gmra.mxu2 %vm185_vm8, %v1754_v57 }
 0x205   :  { %v353_v60 = vpop.permute.xlu2 %352 }
 0x206   :  { %1413 = vmatpush.xpose.msk.msra.mxu2 %vm185_vm8, %v353_v60  ;;  %v178_v60 = vld [vmem:[%s2150_s1] sm:$0xff] }
 0x20d   :  { %v351_v61 = vpop.permute.xlu2 %350  ;;  %v325_v62 = vpop.permute.xlu0 %324 }
 0x20e   :  { %1411 = vmatpush.xpose.msk.msra.mxu1 %vm185_vm8, %v325_v62  ;;  %1414 = vmatmul.msk.f32.vlgmr.msra.gmra.mxu2 %vm185_vm8, %v351_v61  ;;  %v323_v63 = vpop.permute.xlu1 %322 }
 0x211   :  { %1412 = vmatmul.msk.f32.vlgmr.msra.gmra.mxu1 %vm185_vm8, %v323_v63 }
 0x27c   :  { %v207_v1 = vpop.f32.mrf.mxu2 }
 0x27d   :  { %v237_v2 = vmul.f32 0.25, %v207_v1 }
 0x27f   :  { %v245_v3 = vadd.f32 %v1775_v0, %v237_v2  ;;  %v1498_v2 = vld [vmem:[%s2112_s7] ss:$0 sm:$0xff] }
 0x281   :  { %v248_v4 = vsel %vm247_vm9, %v245_v3, -inf }
 0x282   :  { %249 = vmax.xlane.f32.xlu1 %v248_v4 }
 0x284   :  { %v234_v6 = vpop.f32.mrf.mxu2 }
 0x285   :  { %v238_v7 = vmul.f32 0.25, %v234_v6 }
 0x287   :  { %v246_v8 = vadd.f32 %v1782_v5, %v238_v7 }
 0x289   :  { %v251_v9 = vsel %vm247_vm9, %v246_v8, -inf }
 0x28a   :  { %252 = vmax.xlane.f32.xlu2 %v251_v9 }
 0x28e   :  { %v347_v11 = vpop.f32.mrf.mxu1 }
 0x28f   :  { %v378_v12 = vmul.f32 0.25, %v347_v11 }
 0x291   :  { %v375_v13 = vpop.f32.mrf.mxu2  ;;  %v380_v14 = vadd.f32 %v1775_v0, %v378_v12 }
 0x292   :  { %v379_v15 = vmul.f32 0.25, %v375_v13 }
 0x293   :  { %v382_v16 = vsel %vm247_vm9, %v380_v14, -inf }
 0x294   :  { %383 = vmax.xlane.f32.xlu0 %v382_v16  ;;  %v381_v17 = vadd.f32 %v1782_v5, %v379_v15 }
 0x296   :  { %v385_v18 = vsel %vm247_vm9, %v381_v17, -inf }
 0x297   :  { %386 = vmax.xlane.f32.xlu2 %v385_v18 }
 0x29b   :  { %296 = vrot.lane.b32.xlu1 %v1754_v57, %s2134_s29 }
 0x2a8   :  { %404 = vrot.lane.b32.xlu0 %v1746_v55, %s2133_s30 }
 0x2f5   :  { %v250_v22 = vpop.xlane.xlu1 %249 }
 0x2f6   :  { %v254_v27 = vsub.f32 %v245_v3, %v250_v22 }
 0x2f8   :  { %v256_v30 = vmul.f32 1.442695, %v254_v27  ;;  %v579_v27 = vld [vmem:[%s2116_s10 + $0x8] sm:$0xff] }
 0x2fd   :  { %v253_v19 = vpop.xlane.xlu2 %252 }
 0x2fe   :  { %v255_v20 = vsub.f32 %v246_v8, %v253_v19 }
 0x300   :  { %v258_v21 = vmul.f32 1.442695, %v255_v20 }
 0x302   :  { %1522 = vpow2.f32 %v258_v21 }
 0x307   :  { %v384_v23 = vpop.xlane.xlu0 %383 }
 0x308   :  { %v1523_v24 = vpop.eup %1522  ;;  %v388_v25 = vsub.f32 %v380_v14, %v384_v23 }
 0x309   :  { %v263_v26 = vsel %vm247_vm9, %v1523_v24, 0.0 }
 0x30a   :  { %v390_v28 = vmul.f32 1.442695, %v388_v25  ;;  %264 = vadd.xlane.f32.xlu0 %v263_v26  ;;  %v387_v31 = vpop.xlane.xlu2 %386  ;;  %v580_v26 = vld [vmem:[%s2116_s10 + $0x10] sm:$0xff] }
 0x30b   :  { %v389_v33 = vsub.f32 %v381_v17, %v387_v31 }
 0x30c   :  { %1524 = vpow2.f32 %v390_v28  ;;  %v578_v28 = vld [vmem:[%s2116_s10] sm:$0xff] }
 0x30d   :  { %v297_v29 = vpop.permute.xlu1 %296  ;;  %1526 = vpow2.f32 %v256_v30  ;;  %v392_v35 = vmul.f32 1.442695, %v389_v33 }
 0x30e   :  { %317 = vmatpush.msra.mxu3 %v297_v29 }
 0x30f   :  { %1528 = vpow2.f32 %v392_v35 }
 0x312   :  { %v1525_v32 = vpop.eup %1524 }
 0x313   :  { %v394_v34 = vsel %vm247_vm9, %v1525_v32, 0.0  ;;  %v1527_v36 = vpop.eup %1526 }
 0x314   :  { %395 = vadd.xlane.f32.xlu2 %v394_v34  ;;  %v260_v38 = vsel %vm247_vm9, %v1527_v36, 0.0 }
 0x315   :  { %v1529_v39 = vpop.eup %1528 }
 0x316   :  { %v397_v40 = vsel %vm247_vm9, %v1529_v39, 0.0 }
 0x31a   :  { %v405_v37 = vpop.permute.xlu0 %404 }
 0x31b   :  { %425 = vmatpush.msrb.mxu3 %v405_v37 }
 0x31c   :  { %261 = vadd.xlane.f32.xlu2 %v260_v38 }
 0x31e   :  { %430 = vrot.lane.b32.xlu0 %v1754_v57, %s2133_s30  ;;  %v181_v57 = vld [vmem:[%s2150_s1 + $0x18] sm:$0xff] }
 0x31f   :  { %476 = vmatpush.msrb.mxu2 %v181_v57 }
 0x321   :  { %477 = vmatpush.msrb.mxu2 %v180_v58 }
 0x324   :  { %398 = vadd.xlane.f32.xlu2 %v397_v40 }
 0x33c   :  { %270 = vrot.lane.b32.xlu2 %v1746_v55, %s2134_s29 }
 0x37d   :  { %v265_v41 = vpop.xlane.xlu0 %264 }
 0x37e   :  { %1530 = vrcp.f32 %v265_v41 }
 0x384   :  { %v1531_v42 = vpop.eup %1530 }
 0x385   :  { %v269_v43 = vmul.f32 %v1531_v42, %v1523_v24 }
 0x387   :  { %v396_v44 = vpop.xlane.xlu2 %395  ;;  %1410 = vmatmul.msk.f32.vlgmr.msra.gmra.mxu3 %vm247_vm9, %v269_v43  ;;  %v1499_v43 = vld [vmem:[%s2113_s8] ss:$0 sm:$0xff] }
 0x388   :  { %1532 = vrcp.f32 %v396_v44 }
 0x38e   :  { %v1533_v45 = vpop.eup %1532 }
 0x38f   :  { %v262_v46 = vpop.xlane.xlu2 %261  ;;  %v402_v48 = vmul.f32 %v1533_v45, %v1525_v32 }
 0x390   :  { %v431_v49 = vpop.permute.xlu0 %430  ;;  %1534 = vrcp.f32 %v262_v46 }
 0x391   :  { %1415 = vmatmul.msk.f32.vlgmr.msrb.gmra.mxu3 %vm247_vm9, %v402_v48  ;;  %451 = vmatpush.msrb.mxu1 %v431_v49  ;;  %v1500_v48 = vld [vmem:[%s2114_s9] ss:$0 sm:$0xff] }
 0x396   :  { %v1535_v51 = vpop.eup %1534 }
 0x397   :  { %v399_v50 = vpop.xlane.xlu2 %398  ;;  %v268_v55 = vmul.f32 %v1535_v51, %v1527_v36 }
 0x398   :  { %1536 = vrcp.f32 %v399_v50 }
 0x39e   :  { %v1537_v53 = vpop.eup %1536 }
 0x39f   :  { %v271_v54 = vpop.permute.xlu2 %270  ;;  %v403_v56 = vmul.f32 %v1537_v53, %v1529_v39 }
 0x3a0   :  { %291 = vmatpush.msrb.mxu0 %v271_v54 }
 0x3a1   :  { %1409 = vmatmul.msk.f32.vlgmr.msrb.gmra.mxu0 %vm247_vm9, %v268_v55  ;;  %1416 = vmatmul.msk.f32.vlgmr.msrb.gmra.mxu1 %vm247_vm9, %v403_v56 }
 0x3a2   :  { %505 = vmatpush.msra.mxu0 %v179_v59  ;;  %v640_v59 = vld [vmem:[%s2118_s12 + $0x38] sm:$0xff] }
 0x3a3   :  { %660 = vmatpush.msra.mxu1 %v640_v59 }
 0x3a4   :  { %506 = vmatpush.msra.mxu0 %v178_v60  ;;  %v639_v60 = vld [vmem:[%s2118_s12 + $0x30] sm:$0xff] }
 0x3a5   :  { %661 = vmatpush.msra.mxu1 %v639_v60 }
 0x40a   :  { %v319_v61 = vpop.f32.mrf.mxu3 }
 0x414   :  { %v427_v62 = vpop.f32.mrf.mxu3 }
 0x415   :  { %1417 = vmatmul.msk.f32.vlgmr.msrb.gmra.mxu2 %vm185_vm8, %v427_v62  ;;  %v637_v62 = vld [vmem:[%s2118_s12 + $0x20] sm:$0xff] }
 0x41e   :  { %v293_v63 = vpop.f32.mrf.mxu0  ;;  %v453_v1 = vpop.f32.mrf.mxu1 }
 0x41f   :  { %1418 = vmatmul.msk.f32.gmra.mxu2 %vm185_vm8, %v453_v1  ;;  %1419 = vmatmul.msk.f32.vlgmr.msra.gmra.mxu0 %vm185_vm8, %v293_v63  ;;  %v636_v63 = vld [vmem:[%s2118_s12 + $0x18] sm:$0xff]  ;;  %v635_v1 = vld [vmem:[%s2118_s12 + $0x10] sm:$0xff] }
 0x427   :  { %1420 = vmatmul.msk.f32.gmra.mxu0 %vm185_vm8, %v319_v61  ;;  %v638_v61 = vld [vmem:[%s2118_s12 + $0x28] sm:$0xff] }
 0x428   :  { %662 = vmatpush.msra.mxu1 %v638_v61 }
 0x42a   :  { %663 = vmatpush.msra.mxu1 %v637_v62 }
 0x42c   :  { %664 = vmatpush.msra.mxu1 %v636_v63 }
 0x42e   :  { %665 = vmatpush.msra.mxu1 %v635_v1 }
 0x498   :  { %v479_v3 = vpop.f32.mrf.mxu2 }
 0x49c   :  { %v508_v4 = vpop.f32.mrf.mxu0 }
 0x49d   :  { %v509_v6 = vadd.f32 %v508_v4, %v479_v3  ;;  %v633_v3 = vld [vmem:[%s2118_s12] sm:$0xff] }
 0x49e   :  { %v1501_v4 = vld [vmem:[%s2115_s11] ss:$0 sm:$0xff] }
 0x49f   :  { %v518_v7 = vadd.f32 %v1498_v2, %v509_v6 }
 0x4a1   :  { %v520_v8 = vadd.f32 %v518_v7, %v1735_v47 }
 0x4a2   :  { %v482_v11 = vpop.f32.mrf.mxu2 }
 0x4a3   :  { %v524_v9 = vsel %vm77_vm0, %v520_v8, 0.0 }
 0x4a4   :  { %v511_v12 = vpop.f32.mrf.mxu0  ;;  %525 = vadd.xlane.f32.xlu1 %v524_v9 }
 0x4a5   :  { %v512_v13 = vadd.f32 %v511_v12, %v482_v11 }
 0x4a7   :  { %v519_v14 = vadd.f32 %v1498_v2, %v512_v13  ;;  %v634_v2 = vld [vmem:[%s2118_s12 + $0x8] sm:$0xff] }
 0x4a8   :  { %666 = vmatpush.msra.mxu1 %v634_v2 }
 0x4a9   :  { %v521_v15 = vadd.f32 %v519_v14, %v1739_v52  ;;  %v581_v52 = vld [vmem:[%s2116_s10 + $0x18] sm:$0xff] }
 0x4aa   :  { %604 = vmatpush.msra.mxu3 %v581_v52  ;;  %667 = vmatpush.msra.mxu1 %v633_v3  ;;  %v1503_v3 = vld [vmem:[%s2119_s14] ss:$0 sm:$0xff] }
 0x4ab   :  { %v527_v16 = vsel %vm77_vm0, %v521_v15, 0.0 }
 0x4ac   :  { %528 = vadd.xlane.f32.xlu0 %v527_v16  ;;  %605 = vmatpush.msra.mxu3 %v580_v26 }
 0x4ae   :  { %606 = vmatpush.msra.mxu3 %v579_v27  ;;  %v1502_v27 = vld [vmem:[%s2117_s13] ss:$0 sm:$0xff] }
 0x4b0   :  { %607 = vmatpush.msra.mxu3 %v578_v28 }
 0x517   :  { %v526_v17 = vpop.xlane.xlu1 %525 }
 0x518   :  { %v530_v18 = vmul.f32 %v526_v17, %v1709_v10 }
 0x51a   :  { %v532_v19 = vsub.f32 %v520_v8, %v530_v18 }
 0x51c   :  { %v534_v20 = vmul.f32 %v532_v19, %v532_v19 }
 0x51e   :  { %v536_v21 = vsel %vm77_vm0, %v534_v20, 0.0 }
 0x51f   :  { %537 = vadd.xlane.f32.xlu2 %v536_v21  ;;  %v529_v47 = vpop.xlane.xlu0 %528 }
 0x520   :  { %v531_v22 = vmul.f32 %v529_v47, %v1709_v10 }
 0x522   :  { %v533_v23 = vsub.f32 %v521_v15, %v531_v22 }
 0x524   :  { %v535_v24 = vmul.f32 %v533_v23, %v533_v23 }
 0x526   :  { %v539_v25 = vsel %vm77_vm0, %v535_v24, 0.0 }
 0x527   :  { %540 = vadd.xlane.f32.xlu1 %v539_v25 }
 0x592   :  { %v538_v29 = vpop.xlane.xlu2 %537 }
 0x593   :  { %v542_v30 = vmul.f32 %v538_v29, %v1709_v10 }
 0x595   :  { %v544_v31 = vadd.f32 1e-05, %v542_v30 }
 0x597   :  { %1538 = vrsqrt.f32 %v544_v31  ;;  %vm552_vm11 = vweird.f32 %v544_v31 }
 0x59a   :  { %v541_v32 = vpop.xlane.xlu1 %540 }
 0x59b   :  { %v543_v33 = vmul.f32 %v541_v32, %v1709_v10 }
 0x59d   :  { %v1539_v34 = vpop.eup %1538  ;;  %v545_v35 = vadd.f32 1e-05, %v543_v33 }
 0x59e   :  { %v547_v36 = vmul.f32 %v1539_v34, %v544_v31  ;;  %vm553_vm10 = vweird.f32 %v1539_v34 }
 0x59f   :  { %1540 = vrsqrt.f32 %v545_v35  ;;  %vm554_vm12 = vmor %vm552_vm11, %vm553_vm10  ;;  %vm562_vm14 = vweird.f32 %v545_v35 }
 0x5a0   :  { %v548_v37 = vmul.f32 %v1539_v34, %v547_v36 }
 0x5a2   :  { %v549_v38 = vmul.f32 0.5, %v548_v37 }
 0x5a4   :  { %v550_v39 = vsub.f32 1.5, %v549_v38 }
 0x5a5   :  { %v1541_v40 = vpop.eup %1540 }
 0x5a6   :  { %v551_v41 = vmul.f32 %v1539_v34, %v550_v39  ;;  %v557_v42 = vmul.f32 %v1541_v40, %v545_v35  ;;  %vm563_vm13 = vweird.f32 %v1541_v40 }
 0x5a7   :  { %vm564_vm15 = vmor %vm562_vm14, %vm563_vm13 }
 0x5a8   :  { %v555_v44 = vsel %vm554_vm12, %v1539_v34, %v551_v41  ;;  %v558_v45 = vmul.f32 %v1541_v40, %v557_v42 }
 0x5a9   :  { %v566_v46 = vmul.f32 %v555_v44, %v532_v19 }
 0x5aa   :  { %v559_v49 = vmul.f32 0.5, %v558_v45 }
 0x5ab   :  { %v571_v50 = vmul.f32 %v1499_v43, %v566_v46  ;;  %v1428_v46 = vld [vmem:[%s2145_s23 + $0x38] sm:$0xff] }
 0x5ac   :  { %v560_v51 = vsub.f32 1.5, %v559_v49  ;;  %761 = vmatpush.msra.mxu2 %v1428_v46  ;;  %v1426_v49 = vld [vmem:[%s2145_s23 + $0x28] sm:$0xff] }
 0x5ad   :  { %v576_v53 = vadd.f32 %v1500_v48, %v571_v50  ;;  %v1425_v50 = vld [vmem:[%s2145_s23 + $0x20] sm:$0xff] }
 0x5ae   :  { %v561_v54 = vmul.f32 %v1541_v40, %v560_v51 }
 0x5af   :  { %1421 = vmatmul.msk.f32.vlgmr.msra.gmra.mxu3 %vm77_vm0, %v576_v53 }
 0x5b0   :  { %v565_v55 = vsel %vm564_vm15, %v1541_v40, %v561_v54 }
 0x5b1   :  { %v567_v56 = vmul.f32 %v565_v55, %v533_v23 }
 0x5b3   :  { %v572_v57 = vmul.f32 %v1499_v43, %v567_v56 }
 0x5b5   :  { %v577_v58 = vadd.f32 %v1500_v48, %v572_v57  ;;  %v1427_v48 = vld [vmem:[%s2145_s23 + $0x30] sm:$0xff] }
 0x5b6   :  { %762 = vmatpush.msra.mxu2 %v1427_v48 }
 0x5b7   :  { %1422 = vmatmul.msk.f32.gmra.mxu3 %vm77_vm0, %v577_v58 }
 0x5b8   :  { %763 = vmatpush.msra.mxu2 %v1426_v49 }
 0x5ba   :  { %764 = vmatpush.msra.mxu2 %v1425_v50 }
 0x632   :  { %v609_v6 = vpop.f32.mrf.mxu3 }
 0x633   :  { %v610_v7 = vadd.f32 %v1501_v4, %v609_v6 }
 0x635   :  { %v617_v8 = vmul.f32 0.044715, %v610_v7  ;;  %v615_v47 = vmul.f32 0.5, %v610_v7 }
 0x637   :  { %v619_v9 = vmul.f32 %v617_v8, %v610_v7  ;;  %v1504_v8 = vld [vmem:[%s2120_s15] ss:$0 sm:$0xff] }
 0x639   :  { %v621_v11 = vmul.f32 %v619_v9, %v610_v7 }
 0x63a   :  { %v612_v12 = vpop.f32.mrf.mxu3 }
 0x63b   :  { %v623_v13 = vadd.f32 %v621_v11, %v610_v7  ;;  %v613_v14 = vadd.f32 %v1501_v4, %v612_v12 }
 0x63d   :  { %v625_v15 = vmul.f32 0.7978846, %v623_v13  ;;  %v618_v16 = vmul.f32 0.044715, %v613_v14  ;;  %v616_v25 = vmul.f32 0.5, %v613_v14 }
 0x63f   :  { %1542 = vtanh.f32 %v625_v15  ;;  %v620_v17 = vmul.f32 %v618_v16, %v613_v14 }
 0x641   :  { %v622_v18 = vmul.f32 %v620_v17, %v613_v14 }
 0x643   :  { %v624_v19 = vadd.f32 %v622_v18, %v613_v14 }
 0x645   :  { %v1543_v20 = vpop.eup %1542  ;;  %v626_v21 = vmul.f32 0.7978846, %v624_v19  ;;  %v1505_v19 = vld [vmem:[%s2148_s2 + $0x1] ss:$0 sm:$0xff]  ;;  %s2152_s2 = smov 64  }
 0x646   :  { %v629_v22 = vadd.f32 1.0, %v1543_v20 }
 0x647   :  { %1544 = vtanh.f32 %v626_v21 }
 0x648   :  { %v631_v23 = vmul.f32 %v629_v22, %v615_v47 }
 0x64a   :  { %1423 = vmatmul.msk.f32.vlgmr.msra.gmra.mxu1 %vm645_vm1, %v631_v23 }
 0x64d   :  { %v1545_v24 = vpop.eup %1544 }
 0x64e   :  { %v630_v52 = vadd.f32 1.0, %v1545_v24 }
 0x650   :  { %v632_v26 = vmul.f32 %v630_v52, %v616_v25 }
 0x652   :  { %1424 = vmatmul.msk.f32.gmra.mxu1 %vm645_vm1, %v632_v26 }
 0x6c7   :  { %v669_v28 = vpop.f32.mrf.mxu1 }
 0x6c8   :  { %v670_v29 = vadd.f32 %v1502_v27, %v669_v28 }
 0x6ca   :  { %v675_v30 = vadd.f32 %v670_v29, %v576_v53 }
 0x6cc   :  { %v679_v31 = vsel %vm77_vm0, %v675_v30, 0.0 }
 0x6cd   :  { %680 = vadd.xlane.f32.xlu0 %v679_v31 }
 0x6cf   :  { %v672_v32 = vpop.f32.mrf.mxu1 }
 0x6d0   :  { %v673_v33 = vadd.f32 %v1502_v27, %v672_v32 }
 0x6d2   :  { %v676_v34 = vadd.f32 %v673_v33, %v577_v58 }
 0x6d4   :  { %v682_v35 = vsel %vm77_vm0, %v676_v34, 0.0 }
 0x6d5   :  { %683 = vadd.xlane.f32.xlu1 %v682_v35 }
 0x740   :  { %v681_v36 = vpop.xlane.xlu0 %680 }
 0x741   :  { %v685_v37 = vmul.f32 %v681_v36, %v1709_v10 }
 0x743   :  { %v687_v38 = vsub.f32 %v675_v30, %v685_v37 }
 0x745   :  { %v689_v39 = vmul.f32 %v687_v38, %v687_v38 }
 0x747   :  { %v691_v40 = vsel %vm77_vm0, %v689_v39, 0.0 }
 0x748   :  { %v684_v41 = vpop.xlane.xlu1 %683  ;;  %692 = vadd.xlane.f32.xlu0 %v691_v40 }
 0x749   :  { %v686_v42 = vmul.f32 %v684_v41, %v1709_v10 }
 0x74b   :  { %v688_v43 = vsub.f32 %v676_v34, %v686_v42 }
 0x74d   :  { %v690_v44 = vmul.f32 %v688_v43, %v688_v43 }
 0x74f   :  { %v694_v45 = vsel %vm77_vm0, %v690_v44, 0.0 }
 0x750   :  { %695 = vadd.xlane.f32.xlu1 %v694_v45 }
 0x7bb   :  { %v693_v51 = vpop.xlane.xlu0 %692 }
 0x7bc   :  { %v697_v53 = vmul.f32 %v693_v51, %v1709_v10 }
 0x7be   :  { %v699_v54 = vadd.f32 1e-05, %v697_v53 }
 0x7c0   :  { %1546 = vrsqrt.f32 %v699_v54  ;;  %vm707_vm3 = vweird.f32 %v699_v54 }
 0x7c3   :  { %v696_v55 = vpop.xlane.xlu1 %695 }
 0x7c4   :  { %v698_v56 = vmul.f32 %v696_v55, %v1709_v10 }
 0x7c6   :  { %v1547_v57 = vpop.eup %1546  ;;  %v700_v58 = vadd.f32 1e-05, %v698_v56 }
 0x7c7   :  { %v702_v59 = vmul.f32 %v1547_v57, %v699_v54  ;;  %vm708_vm2 = vweird.f32 %v1547_v57 }
 0x7c8   :  { %1548 = vrsqrt.f32 %v700_v58  ;;  %vm709_vm4 = vmor %vm707_vm3, %vm708_vm2  ;;  %vm717_vm6 = vweird.f32 %v700_v58 }
 0x7c9   :  { %v703_v60 = vmul.f32 %v1547_v57, %v702_v59 }
 0x7cb   :  { %v704_v61 = vmul.f32 0.5, %v703_v60 }
 0x7cd   :  { %v705_v62 = vsub.f32 1.5, %v704_v61 }
 0x7ce   :  { %v1549_v63 = vpop.eup %1548 }
 0x7cf   :  { %v706_v1 = vmul.f32 %v1547_v57, %v705_v62  ;;  %v712_v2 = vmul.f32 %v1549_v63, %v700_v58  ;;  %vm718_vm5 = vweird.f32 %v1549_v63 }
 0x7d0   :  { %vm719_vm7 = vmor %vm717_vm6, %vm718_vm5 }
 0x7d1   :  { %v710_v4 = vsel %vm709_vm4, %v1547_v57, %v706_v1  ;;  %v713_v6 = vmul.f32 %v1549_v63, %v712_v2 }
 0x7d2   :  { %v721_v7 = vmul.f32 %v710_v4, %v687_v38  ;;  %v1433_v4 = vld [vmem:[%s2150_s1 + $0x28] sm:$0xff] }
 0x7d3   :  { %v714_v9 = vmul.f32 0.5, %v713_v6 }
 0x7d4   :  { %v726_v11 = vmul.f32 %v1503_v3, %v721_v7 }
 0x7d5   :  { %v715_v12 = vsub.f32 1.5, %v714_v9 }
 0x7d6   :  { %v1913_v13 = vadd.f32 %v1504_v8, %v726_v11 }
 0x7d7   :  { %v716_v14 = vmul.f32 %v1549_v63, %v715_v12 }
 0x7d8   :  { %1430 = vmatmul.msk.f32.vlgmr.msra.gmra.mxu2 %vm77_vm0, %v1913_v13 }
 0x7d9   :  { %v720_v15 = vsel %vm719_vm7, %v1549_v63, %v716_v14 }
 0x7da   :  { %v722_v16 = vmul.f32 %v720_v15, %v688_v43 }
 0x7dc   :  { %v727_v17 = vmul.f32 %v1503_v3, %v722_v16 }
 0x7de   :  { %v1917_v18 = vadd.f32 %v1504_v8, %v727_v17 }
 0x7e0   :  { %1431 = vmatmul.msk.f32.gmra.mxu2 %vm77_vm0, %v1917_v18 }
 0x85b   :  { %v766_v20 = vpop.f32.mrf.mxu2 }
 0x85c   :  { %v1924_v21 = vadd.f32 %v1505_v19, %v766_v20 }
 0x85e   :  { %778 = vrot.lane.b32.xlu0 %v1924_v21, %s1582_s6 }
 0x863   :  { %v769_v47 = vpop.f32.mrf.mxu2 }
 0x864   :  { %v1928_v22 = vadd.f32 %v1505_v19, %v769_v47 }
 0x866   :  { %939 = vrot.lane.b32.xlu1 %v1928_v22, %s1581_s24  ;;  %805 = vrot.lane.b32.xlu2 %v1928_v22, %s1582_s6  ;;  %v1483_v1 = vpack.i.bf16 %v1928_v22, %v1924_v21 }
 0x867   :  { %937 = vrot.lane.b32.xlu0 %v1928_v22, %s2151_s0 }
 0x86e   :  { %909 = vrot.lane.b32.xlu1 %v1924_v21, %s2151_s0  ;;  %911 = vrot.lane.b32.xlu2 %v1924_v21, %s1581_s24  ;;  %s2153_s24 = smov 48  }
 0x8c0   :  { %v806_v23 = vpop.permute.xlu2 %805 }
 0x8c1   :  { %1438 = vmatpush.xpose.msk.msrb.mxu3 %vm185_vm8, %v806_v23 }
 0x8c4   :  { %1439 = vmatmul.msk.f32.vlgmr.msrb.gmra.mxu3 %vm185_vm8, %v1928_v22 }
 0x8c8   :  { %v912_v24 = vpop.permute.xlu2 %911 }
 0x8c9   :  { %1442 = vmatpush.xpose.msk.msrb.mxu1 %vm185_vm8, %v912_v24  ;;  %v1432_v24 = vld [vmem:[%s2150_s1 + $0x20] sm:$0xff] }
 0x8d0   :  { %v779_v25 = vpop.permute.xlu0 %778 }
 0x8d1   :  { %1436 = vmatpush.xpose.msk.msrb.mxu0 %vm185_vm8, %v779_v25  ;;  %v1435_v25 = vld [vmem:[%s2150_s1 + $0x38] sm:$0xff] }
 0x8d2   :  { %1063 = vmatpush.msra.mxu1 %v1435_v25  ;;  %v1467_v25 = vld [vmem:[%s2118_s12 + $0x68] sm:$0xff] }
 0x8d4   :  { %1437 = vmatmul.msk.f32.vlgmr.msrb.gmra.mxu0 %vm185_vm8, %v1924_v21 }
 0x8d8   :  { %v940_v52 = vpop.permute.xlu1 %939 }
 0x8d9   :  { %1444 = vmatpush.xpose.msk.msrb.mxu2 %vm185_vm8, %v940_v52  ;;  %v938_v26 = vpop.permute.xlu0 %937  ;;  %v1434_v52 = vld [vmem:[%s2150_s1 + $0x30] sm:$0xff] }
 0x8da   :  { %1064 = vmatpush.msra.mxu1 %v1434_v52  ;;  %v1466_v52 = vld [vmem:[%s2118_s12 + $0x60] sm:$0xff] }
 0x8dc   :  { %1445 = vmatmul.msk.f32.vlgmr.msrb.gmra.mxu2 %vm185_vm8, %v938_v26 }
 0x8dd   :  { %1092 = vmatpush.msra.mxu2 %v1433_v4 }
 0x8df   :  { %1093 = vmatpush.msra.mxu2 %v1432_v24  ;;  %v1468_v24 = vld [vmem:[%s2118_s12 + $0x70] sm:$0xff] }
 0x8e0   :  { %v910_v27 = vpop.permute.xlu1 %909 }
 0x8e1   :  { %1443 = vmatmul.msk.f32.vlgmr.msrb.gmra.mxu1 %vm185_vm8, %v910_v27 }
 0x947   :  { %v828_v28 = vpop.f32.mrf.mxu3 }
 0x948   :  { %v832_v29 = vmul.f32 0.25, %v828_v28 }
 0x94a   :  { %v834_v30 = vadd.f32 %v1782_v5, %v832_v29 }
 0x94c   :  { %v838_v31 = vsel %vm247_vm9, %v834_v30, -inf }
 0x94d   :  { %839 = vmax.xlane.f32.xlu2 %v838_v31  ;;  %v1506_v31 = vld [vmem:[%s2112_s7 + $0x1] ss:$0 sm:$0xff] }
 0x951   :  { %v801_v32 = vpop.f32.mrf.mxu0 }
 0x952   :  { %v831_v33 = vmul.f32 0.25, %v801_v32 }
 0x954   :  { %v833_v34 = vadd.f32 %v1775_v0, %v831_v33 }
 0x956   :  { %v835_v35 = vsel %vm247_vm9, %v833_v34, -inf }
 0x957   :  { %836 = vmax.xlane.f32.xlu0 %v835_v35 }
 0x95e   :  { %v934_v36 = vpop.f32.mrf.mxu1 }
 0x95f   :  { %v965_v37 = vmul.f32 0.25, %v934_v36  ;;  %v962_v38 = vpop.f32.mrf.mxu2 }
 0x960   :  { %v966_v39 = vmul.f32 0.25, %v962_v38 }
 0x961   :  { %v967_v40 = vadd.f32 %v1775_v0, %v965_v37 }
 0x962   :  { %v968_v41 = vadd.f32 %v1782_v5, %v966_v39 }
 0x963   :  { %v969_v42 = vsel %vm247_vm9, %v967_v40, -inf }
 0x964   :  { %970 = vmax.xlane.f32.xlu1 %v969_v42  ;;  %v972_v43 = vsel %vm247_vm9, %v968_v41, -inf }
 0x965   :  { %973 = vmax.xlane.f32.xlu0 %v972_v43 }
 0x9c0   :  { %v840_v44 = vpop.xlane.xlu2 %839 }
 0x9c1   :  { %v842_v45 = vsub.f32 %v834_v30, %v840_v44 }
 0x9c3   :  { %v845_v46 = vmul.f32 1.442695, %v842_v45 }
 0x9c5   :  { %1550 = vpow2.f32 %v845_v46 }
 0x9ca   :  { %v837_v48 = vpop.xlane.xlu0 %836 }
 0x9cb   :  { %v1551_v49 = vpop.eup %1550  ;;  %v841_v50 = vsub.f32 %v833_v34, %v837_v48 }
 0x9cc   :  { %v850_v51 = vsel %vm247_vm9, %v1551_v49, 0.0 }
 0x9cd   :  { %v843_v53 = vmul.f32 1.442695, %v841_v50  ;;  %851 = vadd.xlane.f32.xlu1 %v850_v51 }
 0x9cf   :  { %1552 = vpow2.f32 %v843_v53 }
 0x9d5   :  { %v1553_v0 = vpop.eup %1552 }
 0x9d6   :  { %v847_v5 = vsel %vm247_vm9, %v1553_v0, 0.0 }
 0x9d7   :  { %v971_v54 = vpop.xlane.xlu1 %970  ;;  %848 = vadd.xlane.f32.xlu2 %v847_v5  ;;  %v1456_v5 = vld [vmem:[%s2116_s10 + $0x28] sm:$0xff] }
 0x9d8   :  { %v975_v55 = vsub.f32 %v967_v40, %v971_v54  ;;  %v974_v56 = vpop.xlane.xlu0 %973  ;;  %v1455_v54 = vld [vmem:[%s2116_s10 + $0x20] sm:$0xff] }
 0x9d9   :  { %v976_v57 = vsub.f32 %v968_v41, %v974_v56 }
 0x9da   :  { %v977_v58 = vmul.f32 1.442695, %v975_v55 }
 0x9db   :  { %v979_v59 = vmul.f32 1.442695, %v976_v57 }
 0x9dc   :  { %1554 = vpow2.f32 %v977_v58 }
 0x9dd   :  { %1556 = vpow2.f32 %v979_v59 }
 0x9e2   :  { %v1555_v60 = vpop.eup %1554 }
 0x9e3   :  { %v1557_v61 = vpop.eup %1556  ;;  %v981_v62 = vsel %vm247_vm9, %v1555_v60, 0.0 }
 0x9e4   :  { %982 = vadd.xlane.f32.xlu0 %v981_v62  ;;  %v984_v63 = vsel %vm247_vm9, %v1557_v61, 0.0 }
 0x9e5   :  { %985 = vadd.xlane.f32.xlu1 %v984_v63 }
 0x9ef   :  { %1484 = vrot.lane.b32.xlu2 %v1483_v1, %s2152_s2 }
 0x9f8   :  { %1489 = vrot.lane.b32.xlu0 %v1483_v1, %s2153_s24 }
 0xa40   :  { %v852_v2 = vpop.xlane.xlu1 %851 }
 0xa41   :  { %1558 = vrcp.f32 %v852_v2 }
 0xa47   :  { %v1559_v6 = vpop.eup %1558 }
 0xa48   :  { %v856_v12 = vmul.f32 %v1559_v6, %v1551_v49 }
 0xa4a   :  { %v849_v3 = vpop.xlane.xlu2 %848 }
 0xa4b   :  { %1560 = vrcp.f32 %v849_v3 }
 0xa51   :  { %v1561_v7 = vpop.eup %1560 }
 0xa52   :  { %v1485_v8 = vpop.permute.xlu2 %1484  ;;  %v855_v14 = vmul.f32 %v1561_v7, %v1553_v0  ;;  %v1457_v0 = vld [vmem:[%s2116_s10 + $0x30] sm:$0xff]  ;;  %v1507_v7 = vld [vmem:[%s2113_s8 + $0x1] ss:$0 sm:$0xff] }
 0xa53   :  { %v1487_v9 = vunpack.i.h.bf16 %v1485_v8  ;;  %v1486_v11 = vunpack.i.l.bf16 %v1485_v8 }
 0xa55   :  { %878 = vmatpush.msra.mxu0 %v1486_v11  ;;  %904 = vmatpush.msra.mxu3 %v1487_v9 }
 0xa56   :  { %1440 = vmatmul.msk.f32.vlgmr.msra.gmra.mxu0 %vm247_vm9, %v855_v14  ;;  %1441 = vmatmul.msk.f32.vlgmr.msra.gmra.mxu3 %vm247_vm9, %v856_v12  ;;  %v1508_v12 = vld [vmem:[%s2114_s9 + $0x1] ss:$0 sm:$0xff] }
 0xa57   :  { %v983_v15 = vpop.xlane.xlu0 %982 }
 0xa58   :  { %v986_v16 = vpop.xlane.xlu1 %985  ;;  %1562 = vrcp.f32 %v983_v15 }
 0xa59   :  { %1564 = vrcp.f32 %v986_v16 }
 0xa5e   :  { %v1563_v17 = vpop.eup %1562 }
 0xa5f   :  { %v1565_v19 = vpop.eup %1564  ;;  %v989_v22 = vmul.f32 %v1563_v17, %v1555_v60 }
 0xa60   :  { %v990_v23 = vmul.f32 %v1565_v19, %v1557_v61 }
 0xa6a   :  { %v1490_v20 = vpop.permute.xlu0 %1489 }
 0xa6b   :  { %v1492_v21 = vunpack.i.h.bf16 %v1490_v20  ;;  %v1491_v47 = vunpack.i.l.bf16 %v1490_v20 }
 0xa6d   :  { %1012 = vmatpush.msrb.mxu0 %v1491_v47  ;;  %1038 = vmatpush.msrb.mxu3 %v1492_v21 }
 0xa6e   :  { %1446 = vmatmul.msk.f32.vlgmr.msrb.gmra.mxu0 %vm247_vm9, %v989_v22  ;;  %1447 = vmatmul.msk.f32.vlgmr.msrb.gmra.mxu3 %vm247_vm9, %v990_v23  ;;  %v1469_v23 = vld [vmem:[%s2118_s12 + $0x78] sm:$0xff] }
 0xa6f   :  { %1253 = vmatpush.msra.mxu3 %v1469_v23 }
 0xa71   :  { %1254 = vmatpush.msra.mxu3 %v1468_v24 }
 0xa73   :  { %1255 = vmatpush.msra.mxu3 %v1467_v25 }
 0xa75   :  { %1256 = vmatpush.msra.mxu3 %v1466_v52 }
 0xad3   :  { %v880_v26 = vpop.f32.mrf.mxu0 }
 0xad4   :  { %1450 = vmatmul.msk.f32.vlgmr.msra.gmra.mxu2 %vm185_vm8, %v880_v26  ;;  %v1465_v26 = vld [vmem:[%s2118_s12 + $0x58] sm:$0xff] }
 0xad5   :  { %1257 = vmatpush.msra.mxu3 %v1465_v26  ;;  %v27_v26 = vstv %s2125_s21 }
 0xad6   :  { %28 = vst [vmem:[#allocation2] sm:$0x1] %v27_v26 }
 0xad9   :  { %v906_v27 = vpop.f32.mrf.mxu3 }
 0xadc   :  { %1451 = vmatmul.msk.f32.gmra.mxu2 %vm185_vm8, %v906_v27  ;;  %v1464_v27 = vld [vmem:[%s2118_s12 + $0x50] sm:$0xff] }
 0xadd   :  { %1258 = vmatpush.msra.mxu3 %v1464_v27 }
 0xaeb   :  { %v1014_v28 = vpop.f32.mrf.mxu0 }
 0xaec   :  { %1448 = vmatmul.msk.f32.vlgmr.msra.gmra.mxu1 %vm185_vm8, %v1014_v28  ;;  %v1463_v28 = vld [vmem:[%s2118_s12 + $0x48] sm:$0xff] }
 0xaed   :  { %1259 = vmatpush.msra.mxu3 %v1463_v28 }
 0xaf1   :  { %v1040_v29 = vpop.f32.mrf.mxu3 }
 0xaf4   :  { %1449 = vmatmul.msk.f32.gmra.mxu1 %vm185_vm8, %v1040_v29  ;;  %v1462_v29 = vld [vmem:[%s2118_s12 + $0x40] sm:$0xff] }
 0xaf5   :  { %1260 = vmatpush.msra.mxu3 %v1462_v29 }
 0xb57   :  { %v1095_v30 = vpop.f32.mrf.mxu2 }
 0xb5f   :  { %v1098_v37 = vpop.f32.mrf.mxu2 }
 0xb69   :  { %v1066_v32 = vpop.f32.mrf.mxu1 }
 0xb6a   :  { %v1096_v33 = vadd.f32 %v1095_v30, %v1066_v32  ;;  %v1509_v30 = vld [vmem:[%s2115_s11 + $0x1] ss:$0 sm:$0xff] }
 0xb6c   :  { %v1106_v34 = vadd.f32 %v1506_v31, %v1096_v33 }
 0xb6e   :  { %v1108_v35 = vadd.f32 %v1106_v34, %v1913_v13 }
 0xb70   :  { %v1114_v36 = vsel %vm77_vm0, %v1108_v35, 0.0 }
 0xb71   :  { %1115 = vadd.xlane.f32.xlu1 %v1114_v36  ;;  %v1069_v38 = vpop.f32.mrf.mxu1 }
 0xb72   :  { %v1099_v39 = vadd.f32 %v1098_v37, %v1069_v38 }
 0xb74   :  { %v1107_v40 = vadd.f32 %v1506_v31, %v1099_v39 }
 0xb76   :  { %v1109_v41 = vadd.f32 %v1107_v40, %v1917_v18  ;;  %v1458_v18 = vld [vmem:[%s2116_s10 + $0x38] sm:$0xff] }
 0xb77   :  { %1196 = vmatpush.msra.mxu0 %v1458_v18  ;;  %v1510_v18 = vld [vmem:[%s2117_s13 + $0x1] ss:$0 sm:$0xff] }
 0xb78   :  { %v1117_v42 = vsel %vm77_vm0, %v1109_v41, 0.0 }
 0xb79   :  { %1118 = vadd.xlane.f32.xlu1 %v1117_v42  ;;  %1197 = vmatpush.msra.mxu0 %v1457_v0 }
 0xb7b   :  { %1198 = vmatpush.msra.mxu0 %v1456_v5 }
 0xb7d   :  { %1199 = vmatpush.msra.mxu0 %v1455_v54 }
 0xbe4   :  { %v1116_v43 = vpop.xlane.xlu1 %1115 }
 0xbe5   :  { %v1120_v44 = vmul.f32 %v1116_v43, %v1709_v10 }
 0xbe7   :  { %v1122_v45 = vsub.f32 %v1108_v35, %v1120_v44 }
 0xbe9   :  { %v1124_v46 = vmul.f32 %v1122_v45, %v1122_v45 }
 0xbeb   :  { %v1126_v48 = vsel %vm77_vm0, %v1124_v46, 0.0 }
 0xbec   :  { %1127 = vadd.xlane.f32.xlu2 %v1126_v48  ;;  %v1119_v13 = vpop.xlane.xlu1 %1118 }
 0xbed   :  { %v1121_v49 = vmul.f32 %v1119_v13, %v1709_v10 }
 0xbef   :  { %v1123_v50 = vsub.f32 %v1109_v41, %v1121_v49 }
 0xbf1   :  { %v1125_v51 = vmul.f32 %v1123_v50, %v1123_v50 }
 0xbf3   :  { %v1129_v53 = vsel %vm77_vm0, %v1125_v51, 0.0 }
 0xbf4   :  { %1130 = vadd.xlane.f32.xlu0 %v1129_v53 }
 0xc5f   :  { %v1128_v55 = vpop.xlane.xlu2 %1127 }
 0xc60   :  { %v1132_v56 = vmul.f32 %v1128_v55, %v1709_v10 }
 0xc62   :  { %v1134_v57 = vadd.f32 1e-05, %v1132_v56 }
 0xc64   :  { %1566 = vrsqrt.f32 %v1134_v57  ;;  %vm1142_vm9 = vweird.f32 %v1134_v57 }
 0xc67   :  { %v1131_v58 = vpop.xlane.xlu0 %1130 }
 0xc68   :  { %v1133_v59 = vmul.f32 %v1131_v58, %v1709_v10 }
 0xc6a   :  { %v1567_v60 = vpop.eup %1566  ;;  %v1135_v61 = vadd.f32 1e-05, %v1133_v59 }
 0xc6b   :  { %v1137_v62 = vmul.f32 %v1567_v60, %v1134_v57  ;;  %vm1143_vm8 = vweird.f32 %v1567_v60 }
 0xc6c   :  { %1568 = vrsqrt.f32 %v1135_v61  ;;  %vm1144_vm10 = vmor %vm1142_vm9, %vm1143_vm8  ;;  %vm1152_vm12 = vweird.f32 %v1135_v61  ;;  %vm1396_vm8 = vcmask 7168  }
 0xc6d   :  { %v1138_v63 = vmul.f32 %v1567_v60, %v1137_v62 }
 0xc6f   :  { %v1139_v1 = vmul.f32 0.5, %v1138_v63 }
 0xc71   :  { %v1140_v2 = vsub.f32 1.5, %v1139_v1 }
 0xc72   :  { %v1569_v3 = vpop.eup %1568 }
 0xc73   :  { %v1141_v4 = vmul.f32 %v1567_v60, %v1140_v2  ;;  %v1147_v6 = vmul.f32 %v1569_v3, %v1135_v61  ;;  %vm1153_vm11 = vweird.f32 %v1569_v3 }
 0xc74   :  { %vm1154_vm13 = vmor %vm1152_vm12, %vm1153_vm11 }
 0xc75   :  { %v1145_v8 = vsel %vm1144_vm10, %v1567_v60, %v1141_v4  ;;  %v1148_v9 = vmul.f32 %v1569_v3, %v1147_v6 }
 0xc76   :  { %v1156_v11 = vmul.f32 %v1145_v8, %v1122_v45  ;;  %v1329_v8 = vld [vmem:[%s2123_s19] sm:$0x1] }
 0xc77   :  { %v1149_v14 = vmul.f32 0.5, %v1148_v9  ;;  %v1330_v9 = vadd.f32 1e-05, %v1329_v8 }
 0xc78   :  { %v1161_v15 = vmul.f32 %v1507_v7, %v1156_v11  ;;  %v1362_v11 = vld [vmem:[%s2124_s20 + $0x18] sm:$0xff] }
 0xc79   :  { %v1150_v16 = vsub.f32 1.5, %v1149_v14  ;;  %1385 = vmatpush.msrb.mxu1 %v1362_v11  ;;  %v1361_v14 = vld [vmem:[%s2124_s20 + $0x10] sm:$0xff]  ;;  %vm1337_vm14 = vweird.f32 %v1330_v9 }
 0xc7a   :  { %v1166_v17 = vadd.f32 %v1508_v12, %v1161_v15 }
 0xc7b   :  { %v1151_v19 = vmul.f32 %v1569_v3, %v1150_v16  ;;  %1386 = vmatpush.msrb.mxu1 %v1361_v14  ;;  %v1360_v16 = vld [vmem:[%s2124_s20 + $0x8] sm:$0xff] }
 0xc7c   :  { %1460 = vmatmul.msk.f32.vlgmr.msra.gmra.mxu0 %vm77_vm0, %v1166_v17 }
 0xc7d   :  { %v1155_v20 = vsel %vm1154_vm13, %v1569_v3, %v1151_v19  ;;  %1387 = vmatpush.msrb.mxu1 %v1360_v16 }
 0xc7e   :  { %v1157_v21 = vmul.f32 %v1155_v20, %v1123_v50  ;;  %v1359_v20 = vld [vmem:[%s2124_s20] sm:$0xff] }
 0xc7f   :  { %1388 = vmatpush.msrb.mxu1 %v1359_v20 }
 0xc80   :  { %v1162_v47 = vmul.f32 %v1507_v7, %v1157_v21 }
 0xc82   :  { %v1167_v22 = vadd.f32 %v1508_v12, %v1162_v47 }
 0xc84   :  { %1461 = vmatmul.msk.f32.gmra.mxu0 %vm77_vm0, %v1167_v22 }
 0xcf9   :  { %v1201_v31 = vpop.f32.mrf.mxu0 }
 0xcfa   :  { %v1202_v32 = vadd.f32 %v1509_v30, %v1201_v31 }
 0xcfc   :  { %v1209_v33 = vmul.f32 0.044715, %v1202_v32  ;;  %v1207_v46 = vmul.f32 0.5, %v1202_v32 }
 0xcfe   :  { %v1211_v34 = vmul.f32 %v1209_v33, %v1202_v32 }
 0xd00   :  { %v1213_v35 = vmul.f32 %v1211_v34, %v1202_v32 }
 0xd01   :  { %v1204_v36 = vpop.f32.mrf.mxu0 }
 0xd02   :  { %v1215_v37 = vadd.f32 %v1213_v35, %v1202_v32  ;;  %v1205_v38 = vadd.f32 %v1509_v30, %v1204_v36  ;;  %v1328_v35 = vld [vmem:[%s2126_s16] sm:$0x1] }
 0xd04   :  { %v1217_v39 = vmul.f32 0.7978846, %v1215_v37  ;;  %v1210_v40 = vmul.f32 0.044715, %v1205_v38  ;;  %v1208_v50 = vmul.f32 0.5, %v1205_v38 }
 0xd05   :  { %v1511_v37 = vld [vmem:[%s2119_s14 + $0x1] ss:$0 sm:$0xff] }
 0xd06   :  { %1570 = vtanh.f32 %v1217_v39  ;;  %v1212_v41 = vmul.f32 %v1210_v40, %v1205_v38  ;;  %v1512_v40 = vld [vmem:[%s2120_s15 + $0x1] ss:$0 sm:$0xff] }
 0xd08   :  { %v1214_v42 = vmul.f32 %v1212_v41, %v1205_v38 }
 0xd0a   :  { %v1216_v43 = vadd.f32 %v1214_v42, %v1205_v38 }
 0xd0c   :  { %v1571_v44 = vpop.eup %1570  ;;  %v1218_v45 = vmul.f32 0.7978846, %v1216_v43 }
 0xd0d   :  { %v1221_v48 = vadd.f32 1.0, %v1571_v44  ;;  %v1513_v44 = vld [vmem:[%s2121_s18] ss:$0 sm:$0xff] }
 0xd0e   :  { %1572 = vtanh.f32 %v1218_v45 }
 0xd0f   :  { %v1223_v13 = vmul.f32 %v1221_v48, %v1207_v46  ;;  %1574 = vrsqrt.f32 %v1330_v9 }
 0xd11   :  { %1471 = vmatmul.msk.f32.vlgmr.msra.gmra.mxu3 %vm645_vm1, %v1223_v13 }
 0xd14   :  { %v1573_v49 = vpop.eup %1572 }
 0xd15   :  { %v1222_v51 = vadd.f32 1.0, %v1573_v49  ;;  %v1575_v12 = vpop.eup %1574 }
 0xd16   :  { %vm1338_vm15 = vweird.f32 %v1575_v12 }
 0xd17   :  { %v1224_v53 = vmul.f32 %v1222_v51, %v1208_v50  ;;  %v1514_v51 = vld [vmem:[%s2122_s17] ss:$0 sm:$0xff] }
 0xd19   :  { %1472 = vmatmul.msk.f32.gmra.mxu3 %vm645_vm1, %v1224_v53  ;;  %vm1339_vm1 = vmor %vm1337_vm14, %vm1338_vm15 }
 0xd94   :  { %v1262_v0 = vpop.f32.mrf.mxu3 }
 0xd95   :  { %v1263_v5 = vadd.f32 %v1510_v18, %v1262_v0 }
 0xd97   :  { %v1268_v54 = vadd.f32 %v1263_v5, %v1166_v17  ;;  %v1332_v17 = vmul.f32 %v1575_v12, %v1330_v9 }
 0xd99   :  { %v1274_v55 = vsel %vm77_vm0, %v1268_v54, 0.0  ;;  %v1333_v47 = vmul.f32 %v1575_v12, %v1332_v17 }
 0xd9a   :  { %1275 = vadd.xlane.f32.xlu1 %v1274_v55 }
 0xd9b   :  { %v1334_v23 = vmul.f32 0.5, %v1333_v47 }
 0xd9c   :  { %v1265_v56 = vpop.f32.mrf.mxu3 }
 0xd9d   :  { %v1266_v57 = vadd.f32 %v1510_v18, %v1265_v56  ;;  %v1335_v28 = vsub.f32 1.5, %v1334_v23 }
 0xd9f   :  { %v1269_v58 = vadd.f32 %v1266_v57, %v1167_v22  ;;  %v1336_v31 = vmul.f32 %v1575_v12, %v1335_v28 }
 0xda1   :  { %v1277_v59 = vsel %vm77_vm0, %v1269_v58, 0.0  ;;  %v1340_v36 = vsel %vm1339_vm1, %v1575_v12, %v1336_v31 }
 0xda2   :  { %1278 = vadd.xlane.f32.xlu1 %v1277_v59  ;;  %v1341_v42 = vmul.f32 %v1340_v36, %v1328_v35  ;;  %v1515_v59 = vld [vmem:[#allocation2] ss:$0 sm:$0xff] }
 0xda4   :  { %v1349_v13 = vperm.slane %v1341_v42, 0 }
 0xe0d   :  { %v1276_v60 = vpop.xlane.xlu1 %1275 }
 0xe0e   :  { %v1280_v61 = vmul.f32 %v1276_v60, %v1709_v10 }
 0xe10   :  { %v1282_v62 = vsub.f32 %v1268_v54, %v1280_v61 }
 0xe12   :  { %v1284_v63 = vmul.f32 %v1282_v62, %v1282_v62 }
 0xe14   :  { %v1286_v1 = vsel %vm77_vm0, %v1284_v63, 0.0 }
 0xe15   :  { %1287 = vadd.xlane.f32.xlu1 %v1286_v1  ;;  %v1279_v2 = vpop.xlane.xlu1 %1278 }
 0xe16   :  { %v1281_v3 = vmul.f32 %v1279_v2, %v1709_v10 }
 0xe18   :  { %v2056_v4 = vsub.f32 %v1269_v58, %v1281_v3 }
 0xe1a   :  { %v1285_v6 = vmul.f32 %v2056_v4, %v2056_v4 }
 0xe1c   :  { %v1289_v7 = vsel %vm77_vm0, %v1285_v6, 0.0 }
 0xe1d   :  { %1290 = vadd.xlane.f32.xlu1 %v1289_v7 }
 0xe88   :  { %v1288_v15 = vpop.xlane.xlu1 %1287 }
 0xe89   :  { %v1292_v19 = vmul.f32 %v1288_v15, %v1709_v10 }
 0xe8b   :  { %v1294_v21 = vadd.f32 1e-05, %v1292_v19 }
 0xe8d   :  { %1576 = vrsqrt.f32 %v1294_v21  ;;  %vm1302_vm3 = vweird.f32 %v1294_v21 }
 0xe90   :  { %v1291_v22 = vpop.xlane.xlu1 %1290 }
 0xe91   :  { %v1293_v24 = vmul.f32 %v1291_v22, %v1709_v10 }
 0xe93   :  { %v1577_v25 = vpop.eup %1576  ;;  %v1295_v52 = vadd.f32 1e-05, %v1293_v24 }
 0xe94   :  { %v1297_v27 = vmul.f32 %v1577_v25, %v1294_v21  ;;  %vm1303_vm2 = vweird.f32 %v1577_v25 }
 0xe95   :  { %1578 = vrsqrt.f32 %v1295_v52  ;;  %vm1304_vm4 = vmor %vm1302_vm3, %vm1303_vm2  ;;  %vm1312_vm6 = vweird.f32 %v1295_v52 }
 0xe96   :  { %v1298_v29 = vmul.f32 %v1577_v25, %v1297_v27 }
 0xe98   :  { %v1299_v30 = vmul.f32 0.5, %v1298_v29 }
 0xe9a   :  { %v1300_v32 = vsub.f32 1.5, %v1299_v30 }
 0xe9b   :  { %v1579_v33 = vpop.eup %1578 }
 0xe9c   :  { %v1301_v10 = vmul.f32 %v1577_v25, %v1300_v32  ;;  %v1307_v34 = vmul.f32 %v1579_v33, %v1295_v52  ;;  %vm1313_vm5 = vweird.f32 %v1579_v33 }
 0xe9d   :  { %vm1314_vm7 = vmor %vm1312_vm6, %vm1313_vm5 }
 0xe9e   :  { %v1305_v38 = vsel %vm1304_vm4, %v1577_v25, %v1301_v10  ;;  %v1308_v39 = vmul.f32 %v1579_v33, %v1307_v34 }
 0xe9f   :  { %v1316_v41 = vmul.f32 %v1305_v38, %v1282_v62 }
 0xea0   :  { %v1309_v43 = vmul.f32 0.5, %v1308_v39 }
 0xea1   :  { %v1321_v45 = vmul.f32 %v1511_v37, %v1316_v41 }
 0xea2   :  { %v1310_v46 = vsub.f32 1.5, %v1309_v43 }
 0xea3   :  { %v1326_v48 = vadd.f32 %v1512_v40, %v1321_v45 }
 0xea4   :  { %v1311_v49 = vmul.f32 %v1579_v33, %v1310_v46 }
 0xea5   :  { %v1346_v50 = vsub.f32 %v1326_v48, %v1513_v44 }
 0xea6   :  { %v1315_v53 = vsel %vm1314_vm7, %v1579_v33, %v1311_v49 }
 0xea7   :  { %v1317_v18 = vmul.f32 %v1315_v53, %v2056_v4  ;;  %v1351_v0 = vmul.f32 %v1349_v13, %v1346_v50 }
 0xea9   :  { %v1322_v5 = vmul.f32 %v1511_v37, %v1317_v18  ;;  %v1357_v54 = vadd.f32 %v1514_v51, %v1351_v0 }
 0xeab   :  { %1475 = vmatmul.msk.f32.vlgmr.msrb.gmra.mxu1 %vm77_vm0, %v1357_v54  ;;  %v1327_v55 = vadd.f32 %v1512_v40, %v1322_v5 }
 0xead   :  { %v1347_v56 = vsub.f32 %v1327_v55, %v1513_v44 }
 0xeaf   :  { %v1352_v57 = vmul.f32 %v1349_v13, %v1347_v56 }
 0xeb1   :  { %v1358_v58 = vadd.f32 %v1514_v51, %v1352_v57 }
 0xeb3   :  { %1476 = vmatmul.msk.f32.gmra.mxu1 %vm77_vm0, %v1358_v58 }
 0xf28   :  { %v1390_v60 = vpop.f32.mrf.mxu1 }
 0xf29   :  { %v1391_v61 = vadd.f32 %v1515_v59, %v1390_v60 }
 0xf2b   :  { %1397 = vst.msk [vmem:[%s2127_s22] sm:$0xff] %vm1396_vm8, %v1391_v61 }
 0xf30   :  { %v1393_v62 = vpop.f32.mrf.mxu1 }
 0xf31   :  { %v1394_v63 = vadd.f32 %v1515_v59, %v1393_v62 }
 0xf33   :  { %1398 = vst.msk [vmem:[%s2127_s22 + $0x8] sm:$0xff] %vm1396_vm8, %v1394_v63 }

</bundles_post_ra>
